<compile_context>
chip_gen: v7x
topology: tpu7x:2x2x1
jax: 0.10.0
libtpu: 0.0.40
codegen_flags: <defaults>
</compile_context>

<pallas_src>
import functools

import numpy as np
import jax
import jax.numpy as jnp
from jax.experimental import pallas as pl
from jax.experimental.pallas import tpu as pltpu


_LANES = 128            # matrices per lane group (batch rides the lane axis)
_MAX_BLOCK_M = 1024     # matrices per grid step (per-buffer ~0.5-1 MiB)
_REL_EPS = 1e-7         # relative eigenvalue floor (f32 roundoff scale)
_ABS_EPS = 1e-37        # absolute floor (guards pathological all-zero input)


def _pick_tiling(m, max_block=_MAX_BLOCK_M):
    """Choose (block_m, m_pad).

    block_m is a multiple of 128 (lane-dense), padding waste is bounded by
    128*(steps-1) (no round-up-to-next-big-block pathology), and there are
    >= 2 grid steps whenever there is enough work so v7x can split the
    'parallel' axis across its two TensorCores.
    """
    lane_groups = pl.cdiv(max(m, 1), _LANES)
    min_steps = 2 if lane_groups >= 2 else 1
    n_steps = max(pl.cdiv(lane_groups * _LANES, max_block), min_steps)
    block_groups = pl.cdiv(lane_groups, n_steps)
    block_m = block_groups * _LANES
    n_steps = pl.cdiv(lane_groups, block_groups)
    return block_m, block_m * n_steps


def _log_congruence_kernel(u_ref, s_ref, o_ref, *, n, vectorize):
    """O = U diag(log s) U^T with the matrix batch on the lane axis.

    u_ref: (n, n, T) eigenvectors, u[i, j, b] = U_b[i, j] (j-th column).
    s_ref: (n, T)    eigenvalues,  s[j, b] (f32).
    o_ref: (n*(n+1)/2, T) if vectorize (rows are triu (i, k) pairs,
           row-major, matching np.triu_indices), else (n*n, T) row-major.

    Pure VPU/EUP/XLU path -- no MXU (per-matrix 16^3 matmuls would be
    issue-bound at tiny MXU occupancy).  All math in f32; only HBM I/O is
    in the (possibly bf16) ref dtype.
    """
    u = u_ref[...].astype(jnp.float32)                    # (n, n, T)
    s = s_ref[...]                                        # (n, T) f32

    # torch.svd of an SPD-up-to-roundoff matrix returns sigma = |lambda|;
    # use |s| with a relative floor so log() never sees 0 / negative noise.
    mag = jnp.abs(s)
    floor = jnp.maximum(_REL_EPS * jnp.max(mag, axis=0, keepdims=True),
                        jnp.float32(_ABS_EPS))
    log_s = jnp.log(jnp.maximum(mag, floor))              # (n, T), EUP

    rows = []
    for i in range(n):                                    # statically unrolled
        lo = i if vectorize else 0                        # symmetry: k >= i only
        w_i = u[i] * log_s                                # (n, T)      VPU
        # o[i, k, b] = sum_j w_i[j, b] * u[k, j, b],  k in [lo, n)
        rows.append(jnp.sum(w_i[None, :, :] * u[lo:], axis=1))   # (n-lo, T)
    o_ref[...] = jnp.concatenate(rows, axis=0).astype(o_ref.dtype)


def _spd_log_map(u_t, s_t, *, block_m, vectorize, out_dtype):
    """u_t: (N, N, Mpad), s_t: (N, Mpad); Mpad % block_m == 0."""
    n, _, m_pad = u_t.shape
    assert m_pad % block_m == 0
    n_out = n * (n + 1) // 2 if vectorize else n * n
    kernel = functools.partial(_log_congruence_kernel, n=n, vectorize=vectorize)
    return pl.pallas_call(
        kernel,
        out_shape=jax.ShapeDtypeStruct((n_out, m_pad), out_dtype),
        grid=(m_pad // block_m,),
        in_specs=[
            pl.BlockSpec((n, n, block_m), lambda i: (0, 0, i)),
            pl.BlockSpec((n, block_m), lambda i: (0, i)),
        ],
        out_specs=pl.BlockSpec((n_out, block_m), lambda i: (0, i)),
        compiler_params=pltpu.CompilerParams(
            dimension_semantics=("parallel",),        # independent blocks (v7x 2 TCs)
            vmem_limit_bytes=32 * 1024 * 1024,        # working set is a few MiB
        ),
    )(u_t, s_t)


class SPDTangentSpace:
    """JAX/Pallas port of spdnet SPDTangentSpace (forward only).

    No learnable parameters.  io_dtype controls the kernel's HBM I/O dtype
    (bf16 by default per the bandwidth analysis; math stays f32 in-kernel).
    """

    def __init__(self, input_size, vectorize=True, io_dtype=jnp.bfloat16):
        self.input_size = input_size
        self.vectorize = vectorize
        self.io_dtype = io_dtype

    def __call__(self, x):
        B, K, N, _ = x.shape
        assert N == self.input_size
        M = B * K
        xf = x.reshape(M, N, N).astype(jnp.float32)

        # TODO(synk): torch.svd / symmetric eigendecomposition has no clean
        # Pallas equivalent; computed with jnp.linalg.eigh (SPD => svd == eigh).
        s, u = jnp.linalg.eigh(xf)                  # s: (M, N), u: (M, N, N)

        block_m, m_pad = _pick_tiling(M)

        # Layout plumbing: put the matrix batch on the lane (minor) axis so
        # every kernel block is lane-dense; cast U to the I/O dtype first.
        u_t = jnp.transpose(u.astype(self.io_dtype), (1, 2, 0))    # (N, N, M)
        s_t = jnp.transpose(s.astype(jnp.float32), (1, 0))         # (N, M)
        if m_pad != M:
            u_t = jnp.pad(u_t, ((0, 0), (0, 0), (0, m_pad - M)))
            s_t = jnp.pad(s_t, ((0, 0), (0, m_pad - M)), constant_values=1.0)

        out_t = _spd_log_map(u_t, s_t, block_m=block_m,
                             vectorize=self.vectorize, out_dtype=self.io_dtype)
        out = jnp.transpose(out_t[:, :M], (1, 0)).astype(x.dtype)  # (M, n_out)

        if self.vectorize:
            return out.reshape(B, K, N * (N + 1) // 2)
        return out.reshape(B, K, N, N)


if __name__ == "__main__":
    B, K, N = 2, 4, 16
    key = jax.random.PRNGKey(0)
    a = jax.random.normal(key, (B, K, N, N), dtype=jnp.float32)
    # Deterministic, well-conditioned SPD inputs: A A^T + 0.5*N*I.
    x = jnp.matmul(a, jnp.swapaxes(a, -1, -2)) + 0.5 * N * jnp.eye(
        N, dtype=jnp.float32
    )

    # High-precision reference from the same (deterministic) eigh factors.
    s_r, u_r = jnp.linalg.eigh(x.reshape(B * K, N, N))
    u64 = np.asarray(u_r, dtype=np.float64)
    s64 = np.asarray(s_r, dtype=np.float64)
    ref_full = np.einsum("mij,mj,mkj->mik", u64, np.log(s64), u64)
    ref_full = ref_full.reshape(B, K, N, N).astype(np.float32)
    ri, ci = np.triu_indices(N)
    ref_vec = ref_full[:, :, ri, ci]

    # 1) f32 I/O, vectorized (strict accuracy check).
    m_f32 = SPDTangentSpace(N, vectorize=True, io_dtype=jnp.float32)
    out_f32 = jax.block_until_ready(m_f32(x))
    assert out_f32.shape == (B, K, N * (N + 1) // 2), out_f32.shape
    assert out_f32.dtype == jnp.float32
    np.testing.assert_allclose(np.asarray(out_f32), ref_vec, rtol=1e-4, atol=1e-4)

    # 2) bf16 I/O (default, bandwidth-optimized), vectorized.
    m_bf16 = SPDTangentSpace(N, vectorize=True)
    out_bf16 = jax.block_until_ready(m_bf16(x))
    assert out_bf16.shape == (B, K, N * (N + 1) // 2), out_bf16.shape
    np.testing.assert_allclose(np.asarray(out_bf16), ref_vec, rtol=5e-2, atol=5e-2)

    # 3) f32 I/O, full-matrix output path (vectorize=False).
    m_full = SPDTangentSpace(N, vectorize=False, io_dtype=jnp.float32)
    out_full = jax.block_until_ready(m_full(x))
    assert out_full.shape == (B, K, N, N), out_full.shape
    np.testing.assert_allclose(np.asarray(out_full), ref_full, rtol=1e-4, atol=1e-4)

    print("KERNEL_OK")
</pallas_src>

<mosaic_0001>
module attributes {stable_mosaic.version = 11 : i64} {
  func.func @_log_congruence_kernel(%arg0: i32, %arg1: memref<16x16x128xf32, #tpu.memory_space<vmem>>, %arg2: memref<16x128xf32, #tpu.memory_space<vmem>>, %arg3: memref<136x128xf32, #tpu.memory_space<vmem>>) attributes {dimension_semantics = [#tpu.dimension_semantics<parallel>], iteration_bounds = array<i64: 1>, scalar_prefetch = 0 : i64, scratch_operands = 0 : i64, tpu.core_type = #tpu.core_type<tc>, window_params = [{transform_indices = @transform_0, window_bounds = array<i64: 16, 16, 128>}, {transform_indices = @transform_1, window_bounds = array<i64: 16, 128>}, {transform_indices = @transform_2, window_bounds = array<i64: 136, 128>}]} {
    %c0 = arith.constant 0 : index
    %c0_0 = arith.constant 0 : index
    %c0_1 = arith.constant 0 : index
    %0 = vector.load %arg1[%c0, %c0_0, %c0_1] : memref<16x16x128xf32, #tpu.memory_space<vmem>>, vector<16x16x128xf32>
    %c0_2 = arith.constant 0 : index
    %c0_3 = arith.constant 0 : index
    %1 = vector.load %arg2[%c0_2, %c0_3] : memref<16x128xf32, #tpu.memory_space<vmem>>, vector<16x128xf32>
    %2 = math.absf %1 : vector<16x128xf32>
    %cst = arith.constant dense<0xFF800000> : vector<128xf32>
    %3 = vector.multi_reduction <maximumf>, %2, %cst [0] : vector<16x128xf32> to vector<128xf32>
    %4 = vector.shape_cast %3 : vector<128xf32> to vector<1x128xf32>
    %cst_4 = arith.constant 1.000000e-07 : f32
    %5 = vector.broadcast %cst_4 : f32 to vector<1x128xf32>
    %6 = arith.mulf %5, %4 : vector<1x128xf32>
    %cst_5 = arith.constant 9.99999991E-38 : f32
    %7 = vector.broadcast %cst_5 : f32 to vector<1x128xf32>
    %8 = arith.maximumf %6, %7 : vector<1x128xf32>
    %9 = vector.broadcast %8 : vector<1x128xf32> to vector<16x128xf32>
    %10 = arith.maximumf %2, %9 : vector<16x128xf32>
    %11 = math.log %10 : vector<16x128xf32>
    %12 = vector.extract_strided_slice %0 {offsets = [0, 0, 0], sizes = [1, 16, 128], strides = [1, 1, 1]} : vector<16x16x128xf32> to vector<1x16x128xf32>
    %13 = vector.shape_cast %12 : vector<1x16x128xf32> to vector<16x128xf32>
    %14 = arith.mulf %13, %11 : vector<16x128xf32>
    %15 = vector.shape_cast %14 : vector<16x128xf32> to vector<1x16x128xf32>
    %16 = vector.broadcast %15 : vector<1x16x128xf32> to vector<16x16x128xf32>
    %17 = arith.mulf %16, %0 : vector<16x16x128xf32>
    %cst_6 = arith.constant dense<0.000000e+00> : vector<16x128xf32>
    %18 = vector.multi_reduction <add>, %17, %cst_6 [1] : vector<16x16x128xf32> to vector<16x128xf32>
    %19 = vector.extract_strided_slice %0 {offsets = [1, 0, 0], sizes = [1, 16, 128], strides = [1, 1, 1]} : vector<16x16x128xf32> to vector<1x16x128xf32>
    %20 = vector.shape_cast %19 : vector<1x16x128xf32> to vector<16x128xf32>
    %21 = arith.mulf %20, %11 : vector<16x128xf32>
    %22 = vector.shape_cast %21 : vector<16x128xf32> to vector<1x16x128xf32>
    %23 = vector.extract_strided_slice %0 {offsets = [1, 0, 0], sizes = [15, 16, 128], strides = [1, 1, 1]} : vector<16x16x128xf32> to vector<15x16x128xf32>
    %24 = vector.broadcast %22 : vector<1x16x128xf32> to vector<15x16x128xf32>
    %25 = arith.mulf %24, %23 : vector<15x16x128xf32>
    %cst_7 = arith.constant dense<0.000000e+00> : vector<15x128xf32>
    %26 = vector.multi_reduction <add>, %25, %cst_7 [1] : vector<15x16x128xf32> to vector<15x128xf32>
    %27 = vector.extract_strided_slice %0 {offsets = [2, 0, 0], sizes = [1, 16, 128], strides = [1, 1, 1]} : vector<16x16x128xf32> to vector<1x16x128xf32>
    %28 = vector.shape_cast %27 : vector<1x16x128xf32> to vector<16x128xf32>
    %29 = arith.mulf %28, %11 : vector<16x128xf32>
    %30 = vector.shape_cast %29 : vector<16x128xf32> to vector<1x16x128xf32>
    %31 = vector.extract_strided_slice %0 {offsets = [2, 0, 0], sizes = [14, 16, 128], strides = [1, 1, 1]} : vector<16x16x128xf32> to vector<14x16x128xf32>
    %32 = vector.broadcast %30 : vector<1x16x128xf32> to vector<14x16x128xf32>
    %33 = arith.mulf %32, %31 : vector<14x16x128xf32>
    %cst_8 = arith.constant dense<0.000000e+00> : vector<14x128xf32>
    %34 = vector.multi_reduction <add>, %33, %cst_8 [1] : vector<14x16x128xf32> to vector<14x128xf32>
    %35 = vector.extract_strided_slice %0 {offsets = [3, 0, 0], sizes = [1, 16, 128], strides = [1, 1, 1]} : vector<16x16x128xf32> to vector<1x16x128xf32>
    %36 = vector.shape_cast %35 : vector<1x16x128xf32> to vector<16x128xf32>
    %37 = arith.mulf %36, %11 : vector<16x128xf32>
    %38 = vector.shape_cast %37 : vector<16x128xf32> to vector<1x16x128xf32>
    %39 = vector.extract_strided_slice %0 {offsets = [3, 0, 0], sizes = [13, 16, 128], strides = [1, 1, 1]} : vector<16x16x128xf32> to vector<13x16x128xf32>
    %40 = vector.broadcast %38 : vector<1x16x128xf32> to vector<13x16x128xf32>
    %41 = arith.mulf %40, %39 : vector<13x16x128xf32>
    %cst_9 = arith.constant dense<0.000000e+00> : vector<13x128xf32>
    %42 = vector.multi_reduction <add>, %41, %cst_9 [1] : vector<13x16x128xf32> to vector<13x128xf32>
    %43 = vector.extract_strided_slice %0 {offsets = [4, 0, 0], sizes = [1, 16, 128], strides = [1, 1, 1]} : vector<16x16x128xf32> to vector<1x16x128xf32>
    %44 = vector.shape_cast %43 : vector<1x16x128xf32> to vector<16x128xf32>
    %45 = arith.mulf %44, %11 : vector<16x128xf32>
    %46 = vector.shape_cast %45 : vector<16x128xf32> to vector<1x16x128xf32>
    %47 = vector.extract_strided_slice %0 {offsets = [4, 0, 0], sizes = [12, 16, 128], strides = [1, 1, 1]} : vector<16x16x128xf32> to vector<12x16x128xf32>
    %48 = vector.broadcast %46 : vector<1x16x128xf32> to vector<12x16x128xf32>
    %49 = arith.mulf %48, %47 : vector<12x16x128xf32>
    %cst_10 = arith.constant dense<0.000000e+00> : vector<12x128xf32>
    %50 = vector.multi_reduction <add>, %49, %cst_10 [1] : vector<12x16x128xf32> to vector<12x128xf32>
    %51 = vector.extract_strided_slice %0 {offsets = [5, 0, 0], sizes = [1, 16, 128], strides = [1, 1, 1]} : vector<16x16x128xf32> to vector<1x16x128xf32>
    %52 = vector.shape_cast %51 : vector<1x16x128xf32> to vector<16x128xf32>
    %53 = arith.mulf %52, %11 : vector<16x128xf32>
    %54 = vector.shape_cast %53 : vector<16x128xf32> to vector<1x16x128xf32>
    %55 = vector.extract_strided_slice %0 {offsets = [5, 0, 0], sizes = [11, 16, 128], strides = [1, 1, 1]} : vector<16x16x128xf32> to vector<11x16x128xf32>
    %56 = vector.broadcast %54 : vector<1x16x128xf32> to vector<11x16x128xf32>
    %57 = arith.mulf %56, %55 : vector<11x16x128xf32>
    %cst_11 = arith.constant dense<0.000000e+00> : vector<11x128xf32>
    %58 = vector.multi_reduction <add>, %57, %cst_11 [1] : vector<11x16x128xf32> to vector<11x128xf32>
    %59 = vector.extract_strided_slice %0 {offsets = [6, 0, 0], sizes = [1, 16, 128], strides = [1, 1, 1]} : vector<16x16x128xf32> to vector<1x16x128xf32>
    %60 = vector.shape_cast %59 : vector<1x16x128xf32> to vector<16x128xf32>
    %61 = arith.mulf %60, %11 : vector<16x128xf32>
    %62 = vector.shape_cast %61 : vector<16x128xf32> to vector<1x16x128xf32>
    %63 = vector.extract_strided_slice %0 {offsets = [6, 0, 0], sizes = [10, 16, 128], strides = [1, 1, 1]} : vector<16x16x128xf32> to vector<10x16x128xf32>
    %64 = vector.broadcast %62 : vector<1x16x128xf32> to vector<10x16x128xf32>
    %65 = arith.mulf %64, %63 : vector<10x16x128xf32>
    %cst_12 = arith.constant dense<0.000000e+00> : vector<10x128xf32>
    %66 = vector.multi_reduction <add>, %65, %cst_12 [1] : vector<10x16x128xf32> to vector<10x128xf32>
    %67 = vector.extract_strided_slice %0 {offsets = [7, 0, 0], sizes = [1, 16, 128], strides = [1, 1, 1]} : vector<16x16x128xf32> to vector<1x16x128xf32>
    %68 = vector.shape_cast %67 : vector<1x16x128xf32> to vector<16x128xf32>
    %69 = arith.mulf %68, %11 : vector<16x128xf32>
    %70 = vector.shape_cast %69 : vector<16x128xf32> to vector<1x16x128xf32>
    %71 = vector.extract_strided_slice %0 {offsets = [7, 0, 0], sizes = [9, 16, 128], strides = [1, 1, 1]} : vector<16x16x128xf32> to vector<9x16x128xf32>
    %72 = vector.broadcast %70 : vector<1x16x128xf32> to vector<9x16x128xf32>
    %73 = arith.mulf %72, %71 : vector<9x16x128xf32>
    %cst_13 = arith.constant dense<0.000000e+00> : vector<9x128xf32>
    %74 = vector.multi_reduction <add>, %73, %cst_13 [1] : vector<9x16x128xf32> to vector<9x128xf32>
    %75 = vector.extract_strided_slice %0 {offsets = [8, 0, 0], sizes = [1, 16, 128], strides = [1, 1, 1]} : vector<16x16x128xf32> to vector<1x16x128xf32>
    %76 = vector.shape_cast %75 : vector<1x16x128xf32> to vector<16x128xf32>
    %77 = arith.mulf %76, %11 : vector<16x128xf32>
    %78 = vector.shape_cast %77 : vector<16x128xf32> to vector<1x16x128xf32>
    %79 = vector.extract_strided_slice %0 {offsets = [8, 0, 0], sizes = [8, 16, 128], strides = [1, 1, 1]} : vector<16x16x128xf32> to vector<8x16x128xf32>
    %80 = vector.broadcast %78 : vector<1x16x128xf32> to vector<8x16x128xf32>
    %81 = arith.mulf %80, %79 : vector<8x16x128xf32>
    %cst_14 = arith.constant dense<0.000000e+00> : vector<8x128xf32>
    %82 = vector.multi_reduction <add>, %81, %cst_14 [1] : vector<8x16x128xf32> to vector<8x128xf32>
    %83 = vector.extract_strided_slice %0 {offsets = [9, 0, 0], sizes = [1, 16, 128], strides = [1, 1, 1]} : vector<16x16x128xf32> to vector<1x16x128xf32>
    %84 = vector.shape_cast %83 : vector<1x16x128xf32> to vector<16x128xf32>
    %85 = arith.mulf %84, %11 : vector<16x128xf32>
    %86 = vector.shape_cast %85 : vector<16x128xf32> to vector<1x16x128xf32>
    %87 = vector.extract_strided_slice %0 {offsets = [9, 0, 0], sizes = [7, 16, 128], strides = [1, 1, 1]} : vector<16x16x128xf32> to vector<7x16x128xf32>
    %88 = vector.broadcast %86 : vector<1x16x128xf32> to vector<7x16x128xf32>
    %89 = arith.mulf %88, %87 : vector<7x16x128xf32>
    %cst_15 = arith.constant dense<0.000000e+00> : vector<7x128xf32>
    %90 = vector.multi_reduction <add>, %89, %cst_15 [1] : vector<7x16x128xf32> to vector<7x128xf32>
    %91 = vector.extract_strided_slice %0 {offsets = [10, 0, 0], sizes = [1, 16, 128], strides = [1, 1, 1]} : vector<16x16x128xf32> to vector<1x16x128xf32>
    %92 = vector.shape_cast %91 : vector<1x16x128xf32> to vector<16x128xf32>
    %93 = arith.mulf %92, %11 : vector<16x128xf32>
    %94 = vector.shape_cast %93 : vector<16x128xf32> to vector<1x16x128xf32>
    %95 = vector.extract_strided_slice %0 {offsets = [10, 0, 0], sizes = [6, 16, 128], strides = [1, 1, 1]} : vector<16x16x128xf32> to vector<6x16x128xf32>
    %96 = vector.broadcast %94 : vector<1x16x128xf32> to vector<6x16x128xf32>
    %97 = arith.mulf %96, %95 : vector<6x16x128xf32>
    %cst_16 = arith.constant dense<0.000000e+00> : vector<6x128xf32>
    %98 = vector.multi_reduction <add>, %97, %cst_16 [1] : vector<6x16x128xf32> to vector<6x128xf32>
    %99 = vector.extract_strided_slice %0 {offsets = [11, 0, 0], sizes = [1, 16, 128], strides = [1, 1, 1]} : vector<16x16x128xf32> to vector<1x16x128xf32>
    %100 = vector.shape_cast %99 : vector<1x16x128xf32> to vector<16x128xf32>
    %101 = arith.mulf %100, %11 : vector<16x128xf32>
    %102 = vector.shape_cast %101 : vector<16x128xf32> to vector<1x16x128xf32>
    %103 = vector.extract_strided_slice %0 {offsets = [11, 0, 0], sizes = [5, 16, 128], strides = [1, 1, 1]} : vector<16x16x128xf32> to vector<5x16x128xf32>
    %104 = vector.broadcast %102 : vector<1x16x128xf32> to vector<5x16x128xf32>
    %105 = arith.mulf %104, %103 : vector<5x16x128xf32>
    %cst_17 = arith.constant dense<0.000000e+00> : vector<5x128xf32>
    %106 = vector.multi_reduction <add>, %105, %cst_17 [1] : vector<5x16x128xf32> to vector<5x128xf32>
    %107 = vector.extract_strided_slice %0 {offsets = [12, 0, 0], sizes = [1, 16, 128], strides = [1, 1, 1]} : vector<16x16x128xf32> to vector<1x16x128xf32>
    %108 = vector.shape_cast %107 : vector<1x16x128xf32> to vector<16x128xf32>
    %109 = arith.mulf %108, %11 : vector<16x128xf32>
    %110 = vector.shape_cast %109 : vector<16x128xf32> to vector<1x16x128xf32>
    %111 = vector.extract_strided_slice %0 {offsets = [12, 0, 0], sizes = [4, 16, 128], strides = [1, 1, 1]} : vector<16x16x128xf32> to vector<4x16x128xf32>
    %112 = vector.broadcast %110 : vector<1x16x128xf32> to vector<4x16x128xf32>
    %113 = arith.mulf %112, %111 : vector<4x16x128xf32>
    %cst_18 = arith.constant dense<0.000000e+00> : vector<4x128xf32>
    %114 = vector.multi_reduction <add>, %113, %cst_18 [1] : vector<4x16x128xf32> to vector<4x128xf32>
    %115 = vector.extract_strided_slice %0 {offsets = [13, 0, 0], sizes = [1, 16, 128], strides = [1, 1, 1]} : vector<16x16x128xf32> to vector<1x16x128xf32>
    %116 = vector.shape_cast %115 : vector<1x16x128xf32> to vector<16x128xf32>
    %117 = arith.mulf %116, %11 : vector<16x128xf32>
    %118 = vector.shape_cast %117 : vector<16x128xf32> to vector<1x16x128xf32>
    %119 = vector.extract_strided_slice %0 {offsets = [13, 0, 0], sizes = [3, 16, 128], strides = [1, 1, 1]} : vector<16x16x128xf32> to vector<3x16x128xf32>
    %120 = vector.broadcast %118 : vector<1x16x128xf32> to vector<3x16x128xf32>
    %121 = arith.mulf %120, %119 : vector<3x16x128xf32>
    %cst_19 = arith.constant dense<0.000000e+00> : vector<3x128xf32>
    %122 = vector.multi_reduction <add>, %121, %cst_19 [1] : vector<3x16x128xf32> to vector<3x128xf32>
    %123 = vector.extract_strided_slice %0 {offsets = [14, 0, 0], sizes = [1, 16, 128], strides = [1, 1, 1]} : vector<16x16x128xf32> to vector<1x16x128xf32>
    %124 = vector.shape_cast %123 : vector<1x16x128xf32> to vector<16x128xf32>
    %125 = arith.mulf %124, %11 : vector<16x128xf32>
    %126 = vector.shape_cast %125 : vector<16x128xf32> to vector<1x16x128xf32>
    %127 = vector.extract_strided_slice %0 {offsets = [14, 0, 0], sizes = [2, 16, 128], strides = [1, 1, 1]} : vector<16x16x128xf32> to vector<2x16x128xf32>
    %128 = vector.broadcast %126 : vector<1x16x128xf32> to vector<2x16x128xf32>
    %129 = arith.mulf %128, %127 : vector<2x16x128xf32>
    %cst_20 = arith.constant dense<0.000000e+00> : vector<2x128xf32>
    %130 = vector.multi_reduction <add>, %129, %cst_20 [1] : vector<2x16x128xf32> to vector<2x128xf32>
    %131 = vector.extract_strided_slice %0 {offsets = [15, 0, 0], sizes = [1, 16, 128], strides = [1, 1, 1]} : vector<16x16x128xf32> to vector<1x16x128xf32>
    %132 = vector.shape_cast %131 : vector<1x16x128xf32> to vector<16x128xf32>
    %133 = arith.mulf %132, %11 : vector<16x128xf32>
    %134 = vector.shape_cast %133 : vector<16x128xf32> to vector<1x16x128xf32>
    %135 = vector.extract_strided_slice %0 {offsets = [15, 0, 0], sizes = [1, 16, 128], strides = [1, 1, 1]} : vector<16x16x128xf32> to vector<1x16x128xf32>
    %136 = arith.mulf %134, %135 : vector<1x16x128xf32>
    %cst_21 = arith.constant dense<0.000000e+00> : vector<1x128xf32>
    %137 = vector.multi_reduction <add>, %136, %cst_21 [1] : vector<1x16x128xf32> to vector<1x128xf32>
    %138 = tpu.concatenate %18, %26, %34, %42, %50, %58, %66, %74, %82, %90, %98, %106, %114, %122, %130, %137 in 0 : vector<16x128xf32>, vector<15x128xf32>, vector<14x128xf32>, vector<13x128xf32>, vector<12x128xf32>, vector<11x128xf32>, vector<10x128xf32>, vector<9x128xf32>, vector<8x128xf32>, vector<7x128xf32>, vector<6x128xf32>, vector<5x128xf32>, vector<4x128xf32>, vector<3x128xf32>, vector<2x128xf32>, vector<1x128xf32> -> vector<136x128xf32>
    %c0_22 = arith.constant 0 : index
    %c0_23 = arith.constant 0 : index
    %139 = vector.load %arg3[%c0_22, %c0_23] : memref<136x128xf32, #tpu.memory_space<vmem>>, vector<136x128xf32>
    tpu.vector_store %arg3[%c0_22, %c0_23], %138 {strides = array<i32>} : memref<136x128xf32, #tpu.memory_space<vmem>>, vector<136x128xf32>,
    return
  }
  func.func @transform_0(%arg0: i32) -> (i32, i32, i32) {
    %c0_i32 = arith.constant 0 : i32
    %c0_i32_0 = arith.constant 0 : i32
    %c0_i32_1 = arith.constant 0 : i32
    return %c0_i32, %c0_i32_0, %arg0 : i32, i32, i32
  }
  func.func @transform_1(%arg0: i32) -> (i32, i32) {
    %c0_i32 = arith.constant 0 : i32
    %c0_i32_0 = arith.constant 0 : i32
    return %c0_i32, %arg0 : i32, i32
  }
  func.func @transform_2(%arg0: i32) -> (i32, i32) {
    %c0_i32 = arith.constant 0 : i32
    %c0_i32_0 = arith.constant 0 : i32
    return %c0_i32, %arg0 : i32, i32
  }
}

</mosaic_0001>

<bundles_post_ra>
// kernel: tpu_custom_call.1
= control target key start
LH: loop header
LB: loop body
LE: loop exit
PB: predicated region body
PF: predicated region fallthrough
CT: control target
= control target key end

     0   :  { %7 = vsyncpa [#allocation3], 0  ;;  %s3224_s0 = inlined_call_operand.hbm [shape: f32[16,16,128], index: 0, kind: input, shape index: {}]   ;;  %s3225_s1 = inlined_call_operand.hbm [shape: f32[16,128], index: 1, kind: input, shape index: {}]   ;;  %s3226_s2 = inlined_call_operand.hbm [shape: f32[136,128], index: 2, kind: output, shape index: {}]  }
   0x1   :  { %8 = vsyncpa [#allocation6], 0 }
   0x2   :  { %9 = vsyncpa [#allocation4], 0  ;;  %s1795_s9 = smov [#allocation2]   ;;  %s1723_s13 = scalar_lea.hbm %s3224_s0, 4096 }
   0x3   :  { %s15_s10 = sshll.u32 %s1795_s9, 4  ;;  %p1724_p0 = scmp.ne.s32.totalorder %s3224_s0, %s1723_s13  ;;  %s16_s10 = int_to_ptr.vmem [resolvable:$true] %s15_s10 }
   0x4   :  { %p1727_p1 = scmp.lt.u32.totalorder %s1723_s13, %s3224_s0 }
   0x6   :  { %p1729_p2 = pnand %p1727_p1, %p1724_p0 }
   0x8   :  { %1732 = shalt.err (!%p1729_p2)
}
   0x9   :  { %s1733_s18 = scalar_lea.vmem %s16_s10, 4096  ;;  %p1738_p4 = scmp.lt.s32.totalorder %s16_s10, %s16_s10 }
   0xa   :  { %p1734_p3 = scmp.ne.s32.totalorder %s16_s10, %s1733_s18  ;;  %p1739_p5 = scmp.lt.s32.totalorder %s1733_s18, %s1733_s18 }
   0xc   :  { %p1740_p6 = por %p1739_p5, %p1738_p4 }
   0xe   :  { %p1741_p7 = pnand %p1740_p6, %p1734_p3 }
  0x10   :  { %1744 = shalt.err (!%p1741_p7)
}
  0x11   :  { %s1796_s19 = smov 128   ;;  %s1797_s20 = smov 8  }
  0x12   :  { %21 = dma.hbm_to_vmem [thread:$0]  %s3224_s0, 4096, %s16_s10, [#allocation3], %s1796_s19, %s1796_s19, %s1797_s20  }
  0x13   :  { %s1798_s23 = smov [#allocation5]   ;;  %s1745_s27 = scalar_lea.hbm %s3225_s1, 256 }
  0x14   :  { %s27_s24 = sshll.u32 %s1798_s23, 4  ;;  %p1746_p8 = scmp.ne.s32.totalorder %s3225_s1, %s1745_s27  ;;  %s28_s24 = int_to_ptr.vmem [resolvable:$true] %s27_s24 }
  0x15   :  { %p1749_p9 = scmp.lt.u32.totalorder %s1745_s27, %s3225_s1 }
  0x17   :  { %p1751_p10 = pnand %p1749_p9, %p1746_p8 }
  0x19   :  { %1754 = shalt.err (!%p1751_p10)
}
  0x1a   :  { %s1755_s4 = scalar_lea.vmem %s28_s24, 256  ;;  %p1760_p12 = scmp.lt.s32.totalorder %s28_s24, %s28_s24 }
  0x1b   :  { %p1756_p11 = scmp.ne.s32.totalorder %s28_s24, %s1755_s4  ;;  %p1761_p13 = scmp.lt.s32.totalorder %s1755_s4, %s1755_s4 }
  0x1d   :  { %p1762_p0 = por %p1761_p13, %p1760_p12 }
  0x1f   :  { %p1763_p1 = pnand %p1762_p0, %p1756_p11 }
  0x21   :  { %1766 = shalt.err (!%p1763_p1)
}
  0x22   :  { %33 = dma.hbm_to_vmem [thread:$0]  %s3225_s1, 256, %s28_s24, [#allocation6], %s1796_s19, %s1796_s19, %s1797_s20  }
  0x23   :  { %1789 = dma.done.wait [#allocation3], 4096  }
  0x24   :  { %1790 = vsyncadd [#allocation3], 4294963200 }
  0x25   :  { %1791 = dma.done.wait [#allocation6], 256  }
  0x26   :  { %1792 = vsyncadd [#allocation6], 4294967040  ;;  %v72_v0 = vld [vmem:[#allocation5] sm:$0xff]  ;;  %v73_v1 = vld [vmem:[#allocation5 + $0x8] sm:$0xff]  ;;  %vm1363_vm0 = vcmask 1041409   ;;  %vm1365_vm1 = vcmask 1042434  }
  0x27   :  { %v74_v2 = vand.u32 2147483647, %v72_v0  ;;  %v75_v3 = vand.u32 2147483647, %v73_v1  ;;  %v40_v15 = vld [vmem:[#allocation2] sm:$0xff]  ;;  %v41_v16 = vld [vmem:[#allocation2 + $0x8] sm:$0xff] }
  0x28   :  { %v1845_v18 = vld [vmem:[#allocation2 + $0x10] sm:$0xff]  ;;  %v1847_v19 = vld [vmem:[#allocation2 + $0x20] sm:$0xff]  ;;  %v1851_v22 = vld [vmem:[#allocation2 + $0x18] sm:$0xff]  ;;  %vm1367_vm2 = vcmask 1043459   ;;  %vm1369_vm3 = vcmask 1044484   ;;  %vm1371_vm4 = vcmask 1045509  }
  0x29   :  { %v76_v4 = vmax.f32 %v74_v2, %v75_v3  ;;  %v1849_v20 = vld [vmem:[#allocation2 + $0x30] sm:$0xff]  ;;  %v1853_v23 = vld [vmem:[#allocation2 + $0x28] sm:$0xff]  ;;  %v1855_v24 = vld [vmem:[#allocation2 + $0x38] sm:$0xff]  ;;  %vm1373_vm5 = vcmask 1046534   ;;  %vm1375_vm6 = vcmask 1047559   ;;  %vm1624_vm7 = vcmask 1046528  }
  0x2a   :  { %v1874_v31 = vld [vmem:[#allocation2 + $0x40] sm:$0xff]  ;;  %v1876_v32 = vld [vmem:[#allocation2 + $0x48] sm:$0xff]  ;;  %v1878_v33 = vld [vmem:[#allocation2 + $0x50] sm:$0xff]  ;;  %vm1626_vm8 = vcmask 1044480   ;;  %vm1628_vm9 = vcmask 1041408   ;;  %vm1630_vm10 = vcmask 1045504  }
  0x2b   :  { %v77_v5 = vrot.slane %v76_v4, 4  ;;  %v1880_v34 = vld [vmem:[#allocation2 + $0x58] sm:$0xff]  ;;  %v1895_v39 = vld [vmem:[#allocation2 + $0x60] sm:$0xff]  ;;  %v1897_v40 = vld [vmem:[#allocation2 + $0x68] sm:$0xff]  ;;  %vm1632_vm11 = vcmask 1040384   ;;  %vm1634_vm12 = vcmask 1042432  }
  0x2c   :  { %3289 = vst [vmem:[#allocation17_spill] sm:$0xff] %v1895_v39  ;;  %3290 = vst [vmem:[#allocation18_spill] sm:$0xff] %v1897_v40  ;;  %v1899_v41 = vld [vmem:[#allocation2 + $0x70] sm:$0xff]  ;;  %v1901_v42 = vld [vmem:[#allocation2 + $0x80] sm:$0xff]  ;;  %vm1636_vm13 = vcmask 1043456   ;;  %s1799_s1 = smov [#allocation7]  }
  0x2d   :  { %v78_v6 = vmax.f32 %v76_v4, %v77_v5  ;;  %3291 = vst [vmem:[#allocation19_spill] sm:$0xff] %v1899_v41  ;;  %3292 = vst [vmem:[#allocation20_spill] sm:$0xff] %v1901_v42  ;;  %v1906_v47 = vld [vmem:[#allocation2 + $0x88] sm:$0xff]  ;;  %v1908_v48 = vld [vmem:[#allocation2 + $0x90] sm:$0xff]  ;;  %s1667_s6 = sshll.u32 %s1799_s1, 4  ;;  %s1668_s6 = int_to_ptr.vmem [resolvable:$true] %s1667_s6 }
  0x2e   :  { %3293 = vst [vmem:[#allocation21_spill] sm:$0xff] %v1906_v47  ;;  %3294 = vst [vmem:[#allocation22_spill] sm:$0xff] %v1908_v48  ;;  %v1910_v49 = vld [vmem:[#allocation2 + $0x98] sm:$0xff]  ;;  %v1917_v55 = vld [vmem:[#allocation2 + $0xa0] sm:$0xff]  ;;  %s1767_s7 = scalar_lea.vmem %s1668_s6, 2176  ;;  %p1772_p3 = scmp.lt.s32.totalorder %s1668_s6, %s1668_s6 }
  0x2f   :  { %v79_v7 = vrot.slane %v78_v6, 2  ;;  %3295 = vst [vmem:[#allocation23_spill] sm:$0xff] %v1910_v49  ;;  %v1915_v54 = vld [vmem:[#allocation2 + $0x78] sm:$0xff]  ;;  %3297 = vst [vmem:[#allocation25_spill] sm:$0xff] %v1917_v55  ;;  %v1919_v56 = vld [vmem:[#allocation2 + $0xa8] sm:$0xff]  ;;  %p1768_p2 = scmp.ne.s32.totalorder %s1668_s6, %s1767_s7  ;;  %p1773_p4 = scmp.lt.s32.totalorder %s1767_s7, %s1767_s7 }
  0x30   :  { %3296 = vst [vmem:[#allocation24_spill] sm:$0xff] %v1915_v54  ;;  %3298 = vst [vmem:[#allocation26_spill] sm:$0xff] %v1919_v56  ;;  %v1925_v61 = vld [vmem:[#allocation2 + $0xb0] sm:$0xff]  ;;  %v1935_v4 = vld [vmem:[#allocation2 + $0xc8] sm:$0xff] }
  0x31   :  { %v80_v8 = vmax.f32 %v78_v6, %v79_v7  ;;  %3299 = vst [vmem:[#allocation27_spill] sm:$0xff] %v1925_v61  ;;  %3302 = vst [vmem:[#allocation30_spill] sm:$0xff] %v1935_v4  ;;  %p1774_p5 = por %p1773_p4, %p1772_p3 }
  0x33   :  { %v81_v9 = vrot.slane %v80_v8, 1  ;;  %p1775_p6 = pnand %p1774_p5, %p1768_p2 }
  0x35   :  { %v82_v10 = vmax.f32 %v80_v8, %v81_v9  ;;  %v1949_v9 = vld [vmem:[#allocation2 + $0xd0] sm:$0xff] }
  0x36   :  { %3303 = vst [vmem:[#allocation31_spill] sm:$0xff] %v1949_v9 }
  0x37   :  { %v83_v11 = vmul.f32 1e-07, %v82_v10  ;;  %v1951_v10 = vld [vmem:[#allocation2 + $0xd8] sm:$0xff] }
  0x38   :  { %3304 = vst [vmem:[#allocation32_spill] sm:$0xff] %v1951_v10 }
  0x39   :  { %v84_v12 = vmax.f32 %v83_v11, 1e-37  ;;  %v1953_v11 = vld [vmem:[#allocation2 + $0xe0] sm:$0xff] }
  0x3a   :  { %3305 = vst [vmem:[#allocation33_spill] sm:$0xff] %v1953_v11 }
  0x3b   :  { %v85_v13 = vmax.f32 %v74_v2, %v84_v12  ;;  %v86_v14 = vmax.f32 %v75_v3, %v84_v12  ;;  %v1931_v2 = vld [vmem:[#allocation2 + $0xb8] sm:$0xff]  ;;  %v1933_v3 = vld [vmem:[#allocation2 + $0xc0] sm:$0xff] }
  0x3c   :  { %3300 = vst [vmem:[#allocation28_spill] sm:$0xff] %v1931_v2  ;;  %3301 = vst [vmem:[#allocation29_spill] sm:$0xff] %v1933_v3 }
  0x3d   :  { %1685 = vlog2.f32 %v85_v13 }
  0x3e   :  { %1687 = vlog2.f32 %v86_v14 }
  0x47   :  { %v1686_v17 = vpop.eup %1685 }
  0x48   :  { %v1688_v21 = vpop.eup %1687  ;;  %v1857_v25 = vmul.f32 0.6931472, %v1686_v17  ;;  %v1969_v17 = vld [vmem:[#allocation2 + $0xf0] sm:$0xff] }
  0x49   :  { %v1859_v26 = vmul.f32 0.6931472, %v1688_v21  ;;  %3307 = vst [vmem:[#allocation35_spill] sm:$0xff] %v1969_v17  ;;  %v1971_v21 = vld [vmem:[#allocation2 + $0xf8] sm:$0xff] }
  0x4a   :  { %3283 = vst [vmem:[#allocation11_spill] sm:$0xff] %v1857_v25  ;;  %v91_v27 = vmul.f32 %v1857_v25, %v40_v15  ;;  %v1864_v28 = vmul.f32 %v1857_v25, %v1845_v18  ;;  %v1868_v29 = vmul.f32 %v1857_v25, %v1847_v19  ;;  %v1872_v30 = vmul.f32 %v1857_v25, %v1849_v20 }
  0x4b   :  { %3284 = vst [vmem:[#allocation12_spill] sm:$0xff] %v1859_v26  ;;  %v92_v35 = vmul.f32 %v1859_v26, %v41_v16  ;;  %v1885_v36 = vmul.f32 %v1859_v26, %v1851_v22  ;;  %v1889_v37 = vmul.f32 %v1859_v26, %v1853_v23  ;;  %v1893_v38 = vmul.f32 %v1859_v26, %v1855_v24 }
  0x4c   :  { %3285 = vst [vmem:[#allocation13_spill] sm:$0xff] %v1868_v29  ;;  %3286 = vst [vmem:[#allocation14_spill] sm:$0xff] %v1872_v30  ;;  %v93_v43 = vmul.f32 %v91_v27, %v40_v15  ;;  %v95_v44 = vmul.f32 %v91_v27, %v1845_v18  ;;  %v97_v45 = vmul.f32 %v91_v27, %v1847_v19 }
  0x4d   :  { %3287 = vst [vmem:[#allocation15_spill] sm:$0xff] %v1889_v37  ;;  %3288 = vst [vmem:[#allocation16_spill] sm:$0xff] %v1893_v38  ;;  %v99_v46 = vmul.f32 %v91_v27, %v1849_v20  ;;  %v94_v50 = vmul.f32 %v92_v35, %v41_v16  ;;  %v96_v51 = vmul.f32 %v92_v35, %v1851_v22  ;;  %v1967_v16 = vld [vmem:[#allocation2 + $0xe8] sm:$0xff] }
  0x4e   :  { %v98_v52 = vmul.f32 %v92_v35, %v1853_v23  ;;  %v100_v53 = vmul.f32 %v92_v35, %v1855_v24  ;;  %v101_v57 = vmul.f32 %v91_v27, %v1874_v31  ;;  %v102_v58 = vmul.f32 %v92_v35, %v1876_v32  ;;  %3306 = vst [vmem:[#allocation34_spill] sm:$0xff] %v1967_v16 }
  0x4f   :  { %v103_v59 = vmul.f32 %v91_v27, %v1878_v33  ;;  %v104_v60 = vmul.f32 %v92_v35, %v1880_v34  ;;  %v105_v62 = vmul.f32 %v91_v27, %v1895_v39  ;;  %v106_v63 = vmul.f32 %v92_v35, %v1897_v40  ;;  %3308 = vst [vmem:[#allocation36_spill] sm:$0xff] %v1971_v21 }
  0x50   :  { %v107_v0 = vmul.f32 %v91_v27, %v1899_v41  ;;  %v108_v1 = vmul.f32 %v92_v35, %v1915_v54  ;;  %v1938_v5 = vmul.f32 %v91_v27, %v1901_v42  ;;  %v1941_v6 = vmul.f32 %v92_v35, %v1906_v47 }
  0x51   :  { %v1944_v7 = vmul.f32 %v91_v27, %v1908_v48  ;;  %v1947_v8 = vmul.f32 %v92_v35, %v1910_v49  ;;  %v1956_v12 = vmul.f32 %v91_v27, %v1917_v55  ;;  %v1959_v13 = vmul.f32 %v92_v35, %v1919_v56 }
  0x52   :  { %v1962_v14 = vmul.f32 %v91_v27, %v1925_v61  ;;  %v1965_v15 = vmul.f32 %v92_v35, %v1931_v2  ;;  %v1974_v26 = vmul.f32 %v91_v27, %v1933_v3  ;;  %v1977_v25 = vmul.f32 %v92_v35, %v1935_v4 }
  0x53   :  { %v1980_v38 = vmul.f32 %v91_v27, %v1949_v9  ;;  %v1983_v30 = vmul.f32 %v92_v35, %v1951_v10  ;;  %v1986_v37 = vmul.f32 %v91_v27, %v1953_v11  ;;  %v1989_v29 = vmul.f32 %v92_v35, %v1967_v16 }
  0x54   :  { %v1992_v2 = vmul.f32 %v91_v27, %v1969_v17  ;;  %v1995_v3 = vmul.f32 %v92_v35, %v1971_v21  ;;  %v125_v4 = vadd.f32 %v94_v50, %v93_v43  ;;  %v132_v61 = vadd.f32 %v96_v51, %v95_v44 }
  0x55   :  { %v139_v56 = vadd.f32 %v98_v52, %v97_v45  ;;  %v146_v9 = vadd.f32 %v100_v53, %v99_v46  ;;  %v153_v55 = vadd.f32 %v102_v58, %v101_v57  ;;  %v160_v49 = vadd.f32 %v104_v60, %v103_v59 }
  0x56   :  { %v167_v10 = vadd.f32 %v106_v63, %v105_v62  ;;  %v174_v48 = vadd.f32 %v108_v1, %v107_v0  ;;  %v126_v47 = vrot.slane %v125_v4, 4  ;;  %v133_v11 = vrot.slane %v132_v61, 4 }
  0x57   :  { %v140_v42 = vrot.slane %v139_v56, 4  ;;  %v147_v54 = vrot.slane %v146_v9, 4  ;;  %v154_v16 = vrot.slane %v153_v55, 4  ;;  %v161_v41 = vrot.slane %v160_v49, 4 }
  0x58   :  { %v168_v40 = vrot.slane %v167_v10, 4  ;;  %v175_v27 = vrot.slane %v174_v48, 4  ;;  %v127_v17 = vadd.f32 %v126_v47, %v125_v4  ;;  %v134_v39 = vadd.f32 %v133_v11, %v132_v61 }
  0x59   :  { %v141_v35 = vadd.f32 %v140_v42, %v139_v56  ;;  %v148_v21 = vadd.f32 %v147_v54, %v146_v9  ;;  %v155_v43 = vadd.f32 %v154_v16, %v153_v55  ;;  %v162_v44 = vadd.f32 %v161_v41, %v160_v49 }
  0x5a   :  { %v169_v45 = vadd.f32 %v168_v40, %v167_v10  ;;  %v176_v46 = vadd.f32 %v175_v27, %v174_v48  ;;  %v128_v50 = vrot.slane %v127_v17, 2  ;;  %v135_v51 = vrot.slane %v134_v39, 2 }
  0x5b   :  { %v142_v52 = vrot.slane %v141_v35, 2  ;;  %v149_v53 = vrot.slane %v148_v21, 2  ;;  %v156_v57 = vrot.slane %v155_v43, 2  ;;  %v163_v58 = vrot.slane %v162_v44, 2 }
  0x5c   :  { %v170_v59 = vrot.slane %v169_v45, 2  ;;  %v177_v60 = vrot.slane %v176_v46, 2  ;;  %v129_v62 = vadd.f32 %v128_v50, %v127_v17  ;;  %v136_v63 = vadd.f32 %v135_v51, %v134_v39 }
  0x5d   :  { %v143_v0 = vadd.f32 %v142_v52, %v141_v35  ;;  %v150_v1 = vadd.f32 %v149_v53, %v148_v21  ;;  %v157_v47 = vadd.f32 %v156_v57, %v155_v43  ;;  %v164_v61 = vadd.f32 %v163_v58, %v162_v44 }
  0x5e   :  { %v171_v42 = vadd.f32 %v170_v59, %v169_v45  ;;  %v178_v54 = vadd.f32 %v177_v60, %v176_v46  ;;  %v130_v55 = vrot.slane %v129_v62, 1  ;;  %v137_v41 = vrot.slane %v136_v63, 1 }
  0x5f   :  { %v144_v40 = vrot.slane %v143_v0, 1  ;;  %v151_v48 = vrot.slane %v150_v1, 1  ;;  %v158_v49 = vrot.slane %v157_v47, 1  ;;  %v165_v56 = vrot.slane %v164_v61, 1 }
  0x60   :  { %v172_v4 = vrot.slane %v171_v42, 1  ;;  %v179_v9 = vrot.slane %v178_v54, 1  ;;  %v1997_v10 = vadd.f32 %v130_v55, %v129_v62  ;;  %v1999_v11 = vadd.f32 %v137_v41, %v136_v63 }
  0x61   :  { %v2001_v16 = vadd.f32 %v144_v40, %v143_v0  ;;  %v2003_v39 = vadd.f32 %v151_v48, %v150_v1  ;;  %v2005_v17 = vadd.f32 %v158_v49, %v157_v47  ;;  %v2007_v21 = vadd.f32 %v165_v56, %v164_v61 }
  0x62   :  { %3309 = vst [vmem:[#allocation37_spill] sm:$0xff] %v1997_v10  ;;  %3310 = vst [vmem:[#allocation38_spill] sm:$0xff] %v1999_v11  ;;  %v2009_v27 = vadd.f32 %v172_v4, %v171_v42  ;;  %v2011_v35 = vadd.f32 %v179_v9, %v178_v54  ;;  %v181_v43 = vadd.f32 %v1941_v6, %v1938_v5 }
  0x63   :  { %3311 = vst [vmem:[#allocation39_spill] sm:$0xff] %v2001_v16  ;;  %3312 = vst [vmem:[#allocation40_spill] sm:$0xff] %v2003_v39  ;;  %v188_v44 = vadd.f32 %v1947_v8, %v1944_v7  ;;  %v195_v45 = vadd.f32 %v1959_v13, %v1956_v12  ;;  %v202_v46 = vadd.f32 %v1965_v15, %v1962_v14 }
  0x64   :  { %3313 = vst [vmem:[#allocation41_spill] sm:$0xff] %v2005_v17  ;;  %3314 = vst [vmem:[#allocation42_spill] sm:$0xff] %v2007_v21  ;;  %v209_v50 = vadd.f32 %v1977_v25, %v1974_v26  ;;  %v216_v51 = vadd.f32 %v1983_v30, %v1980_v38  ;;  %v223_v52 = vadd.f32 %v1989_v29, %v1986_v37  ;;  %v182_v6 = vrot.slane %v181_v43, 4  ;;  %v3343_v21 = vld [vmem:[#allocation35_spill] sm:$0xff] }
  0x65   :  { %3315 = vst [vmem:[#allocation43_spill] sm:$0xff] %v2009_v27  ;;  %3316 = vst [vmem:[#allocation44_spill] sm:$0xff] %v2011_v35  ;;  %v230_v5 = vadd.f32 %v1995_v3, %v1992_v2  ;;  %v189_v7 = vrot.slane %v188_v44, 4  ;;  %v196_v8 = vrot.slane %v195_v45, 4  ;;  %v203_v53 = vrot.slane %v202_v46, 4  ;;  %v3341_v35 = vld [vmem:[#allocation33_spill] sm:$0xff] }
  0x66   :  { %v210_v12 = vrot.slane %v209_v50, 4  ;;  %v217_v13 = vrot.slane %v216_v51, 4  ;;  %v224_v57 = vrot.slane %v223_v52, 4  ;;  %v183_v15 = vadd.f32 %v182_v6, %v181_v43  ;;  %v3342_v27 = vld [vmem:[#allocation34_spill] sm:$0xff] }
  0x67   :  { %v231_v14 = vrot.slane %v230_v5, 4  ;;  %v190_v58 = vadd.f32 %v189_v7, %v188_v44  ;;  %v197_v25 = vadd.f32 %v196_v8, %v195_v45  ;;  %v204_v26 = vadd.f32 %v203_v53, %v202_v46 }
  0x68   :  { %v211_v59 = vadd.f32 %v210_v12, %v209_v50  ;;  %v218_v30 = vadd.f32 %v217_v13, %v216_v51  ;;  %v225_v38 = vadd.f32 %v224_v57, %v223_v52  ;;  %v184_v29 = vrot.slane %v183_v15, 2 }
  0x69   :  { %v232_v60 = vadd.f32 %v231_v14, %v230_v5  ;;  %v191_v37 = vrot.slane %v190_v58, 2  ;;  %v198_v62 = vrot.slane %v197_v25, 2  ;;  %v205_v2 = vrot.slane %v204_v26, 2 }
  0x6a   :  { %v212_v3 = vrot.slane %v211_v59, 2  ;;  %v219_v63 = vrot.slane %v218_v30, 2  ;;  %v226_v0 = vrot.slane %v225_v38, 2  ;;  %v185_v47 = vadd.f32 %v184_v29, %v183_v15  ;;  %v3327_v29 = vld [vmem:[#allocation19_spill] sm:$0xff] }
  0x6b   :  { %v233_v1 = vrot.slane %v232_v60, 2  ;;  %v192_v61 = vadd.f32 %v191_v37, %v190_v58  ;;  %v199_v42 = vadd.f32 %v198_v62, %v197_v25  ;;  %v206_v54 = vadd.f32 %v205_v2, %v204_v26  ;;  %v3328_v62 = vld [vmem:[#allocation24_spill] sm:$0xff] }
  0x6c   :  { %v213_v55 = vadd.f32 %v212_v3, %v211_v59  ;;  %v220_v41 = vadd.f32 %v219_v63, %v218_v30  ;;  %v227_v40 = vadd.f32 %v226_v0, %v225_v38  ;;  %v186_v49 = vrot.slane %v185_v47, 1  ;;  %v3325_v59 = vld [vmem:[#allocation17_spill] sm:$0xff]  ;;  %v3326_v38 = vld [vmem:[#allocation18_spill] sm:$0xff]  ;;  %v3329_v3 = vld [vmem:[#allocation20_spill] sm:$0xff] }
  0x6d   :  { %v234_v48 = vadd.f32 %v233_v1, %v232_v60  ;;  %v193_v56 = vrot.slane %v192_v61, 1  ;;  %v200_v4 = vrot.slane %v199_v42, 1  ;;  %v207_v9 = vrot.slane %v206_v54, 1  ;;  %v3330_v0 = vld [vmem:[#allocation21_spill] sm:$0xff] }
  0x6e   :  { %v214_v43 = vrot.slane %v213_v55, 1  ;;  %v221_v44 = vrot.slane %v220_v41, 1  ;;  %v228_v45 = vrot.slane %v227_v40, 1  ;;  %v2029_v50 = vadd.f32 %v186_v49, %v185_v47  ;;  %v3331_v47 = vld [vmem:[#allocation22_spill] sm:$0xff]  ;;  %v3335_v49 = vld [vmem:[#allocation27_spill] sm:$0xff] }
  0x6f   :  { %v235_v46 = vrot.slane %v234_v48, 1  ;;  %v2031_v51 = vadd.f32 %v193_v56, %v192_v61  ;;  %v2033_v52 = vadd.f32 %v200_v4, %v199_v42  ;;  %v2035_v5 = vadd.f32 %v207_v9, %v206_v54  ;;  %v3332_v42 = vld [vmem:[#allocation23_spill] sm:$0xff]  ;;  %v3336_v4 = vld [vmem:[#allocation28_spill] sm:$0xff] }
  0x70   :  { %3317 = vst [vmem:[#allocation45_spill] sm:$0xff] %v2029_v50  ;;  %v2037_v6 = vadd.f32 %v214_v43, %v213_v55  ;;  %v2039_v7 = vadd.f32 %v221_v44, %v220_v41  ;;  %v2041_v8 = vadd.f32 %v228_v45, %v227_v40  ;;  %v239_v12 = vmul.f32 %v1864_v28, %v1845_v18  ;;  %v3333_v55 = vld [vmem:[#allocation25_spill] sm:$0xff]  ;;  %v3334_v40 = vld [vmem:[#allocation26_spill] sm:$0xff]  ;;  %v3344_v50 = vld [vmem:[#allocation36_spill] sm:$0xff] }
  0x71   :  { %3318 = vst [vmem:[#allocation46_spill] sm:$0xff] %v2031_v51  ;;  %3319 = vst [vmem:[#allocation47_spill] sm:$0xff] %v2033_v52  ;;  %v2043_v53 = vadd.f32 %v235_v46, %v234_v48  ;;  %v240_v13 = vmul.f32 %v1885_v36, %v1851_v22  ;;  %v241_v57 = vmul.f32 %v1864_v28, %v1847_v19  ;;  %v3337_v43 = vld [vmem:[#allocation29_spill] sm:$0xff]  ;;  %v3338_v45 = vld [vmem:[#allocation30_spill] sm:$0xff] }
  0x72   :  { %3320 = vst [vmem:[#allocation48_spill] sm:$0xff] %v2035_v5  ;;  %3321 = vst [vmem:[#allocation49_spill] sm:$0xff] %v2037_v6  ;;  %v242_v14 = vmul.f32 %v1885_v36, %v1853_v23  ;;  %v243_v15 = vmul.f32 %v1864_v28, %v1849_v20  ;;  %v244_v58 = vmul.f32 %v1885_v36, %v1855_v24 }
  0x73   :  { %3322 = vst [vmem:[#allocation50_spill] sm:$0xff] %v2039_v7  ;;  %3323 = vst [vmem:[#allocation51_spill] sm:$0xff] %v2041_v8  ;;  %v245_v25 = vmul.f32 %v1864_v28, %v1874_v31  ;;  %v246_v18 = vmul.f32 %v1885_v36, %v1876_v32  ;;  %v247_v22 = vmul.f32 %v1864_v28, %v1878_v33  ;;  %v3340_v7 = vld [vmem:[#allocation32_spill] sm:$0xff] }
  0x74   :  { %3324 = vst [vmem:[#allocation52_spill] sm:$0xff] %v2043_v53  ;;  %v248_v26 = vmul.f32 %v1885_v36, %v1880_v34  ;;  %v249_v30 = vmul.f32 %v1864_v28, %v3325_v59  ;;  %v250_v60 = vmul.f32 %v1885_v36, %v3326_v38  ;;  %v251_v37 = vmul.f32 %v1864_v28, %v3327_v29  ;;  %v3339_v53 = vld [vmem:[#allocation31_spill] sm:$0xff] }
  0x75   :  { %v252_v2 = vmul.f32 %v1885_v36, %v3328_v62  ;;  %v253_v63 = vmul.f32 %v1864_v28, %v3329_v3  ;;  %v254_v1 = vmul.f32 %v1885_v36, %v3330_v0  ;;  %v2079_v61 = vmul.f32 %v1864_v28, %v3331_v47 }
  0x76   :  { %v2083_v54 = vmul.f32 %v1885_v36, %v3332_v42  ;;  %v2087_v41 = vmul.f32 %v1864_v28, %v3333_v55  ;;  %v2091_v48 = vmul.f32 %v1885_v36, %v3334_v40  ;;  %v2095_v56 = vmul.f32 %v1864_v28, %v3335_v49 }
  0x77   :  { %v2099_v9 = vmul.f32 %v1885_v36, %v3336_v4  ;;  %v2103_v44 = vmul.f32 %v1864_v28, %v3337_v43  ;;  %v2107_v46 = vmul.f32 %v1885_v36, %v3338_v45  ;;  %v2111_v8 = vmul.f32 %v1864_v28, %v3339_v53 }
  0x78   :  { %v2115_v6 = vmul.f32 %v1885_v36, %v3340_v7  ;;  %v2119_v5 = vmul.f32 %v1864_v28, %v3341_v35  ;;  %v2123_v52 = vmul.f32 %v1885_v36, %v3342_v27  ;;  %v2127_v51 = vmul.f32 %v1864_v28, %v3343_v21 }
  0x79   :  { %v2131_v17 = vmul.f32 %v1885_v36, %v3344_v50  ;;  %v269_v39 = vadd.f32 %v240_v13, %v239_v12  ;;  %v276_v16 = vadd.f32 %v242_v14, %v241_v57  ;;  %v283_v11 = vadd.f32 %v244_v58, %v243_v15 }
  0x7a   :  { %v290_v10 = vadd.f32 %v246_v18, %v245_v25  ;;  %v297_v7 = vadd.f32 %v248_v26, %v247_v22  ;;  %v304_v53 = vadd.f32 %v250_v60, %v249_v30  ;;  %v311_v43 = vadd.f32 %v252_v2, %v251_v37 }
  0x7b   :  { %v270_v35 = vrot.slane %v269_v39, 4  ;;  %v277_v45 = vrot.slane %v276_v16, 4  ;;  %v318_v4 = vadd.f32 %v254_v1, %v253_v63  ;;  %v284_v27 = vrot.slane %v283_v11, 4 }
  0x7c   :  { %v291_v49 = vrot.slane %v290_v10, 4  ;;  %v298_v40 = vrot.slane %v297_v7, 4  ;;  %v305_v55 = vrot.slane %v304_v53, 4  ;;  %v312_v42 = vrot.slane %v311_v43, 4 }
  0x7d   :  { %v271_v28 = vadd.f32 %v270_v35, %v269_v39  ;;  %v278_v21 = vadd.f32 %v277_v45, %v276_v16  ;;  %v319_v47 = vrot.slane %v318_v4, 4  ;;  %v285_v36 = vadd.f32 %v284_v27, %v283_v11 }
  0x7e   :  { %v292_v50 = vadd.f32 %v291_v49, %v290_v10  ;;  %v299_v12 = vadd.f32 %v298_v40, %v297_v7  ;;  %v306_v13 = vadd.f32 %v305_v55, %v304_v53  ;;  %v313_v15 = vadd.f32 %v312_v42, %v311_v43 }
  0x7f   :  { %v272_v57 = vrot.slane %v271_v28, 2  ;;  %v279_v14 = vrot.slane %v278_v21, 2  ;;  %v320_v58 = vadd.f32 %v319_v47, %v318_v4  ;;  %v286_v25 = vrot.slane %v285_v36, 2 }
  0x80   :  { %v293_v18 = vrot.slane %v292_v50, 2  ;;  %v300_v22 = vrot.slane %v299_v12, 2  ;;  %v307_v26 = vrot.slane %v306_v13, 2  ;;  %v314_v37 = vrot.slane %v313_v15, 2 }
  0x81   :  { %v273_v30 = vadd.f32 %v272_v57, %v271_v28  ;;  %v280_v60 = vadd.f32 %v279_v14, %v278_v21  ;;  %v321_v2 = vrot.slane %v320_v58, 2  ;;  %v287_v39 = vadd.f32 %v286_v25, %v285_v36 }
  0x82   :  { %v294_v16 = vadd.f32 %v293_v18, %v292_v50  ;;  %v301_v35 = vadd.f32 %v300_v22, %v299_v12  ;;  %v308_v63 = vadd.f32 %v307_v26, %v306_v13  ;;  %v315_v27 = vadd.f32 %v314_v37, %v313_v15 }
  0x83   :  { %v274_v11 = vrot.slane %v273_v30, 1  ;;  %v281_v10 = vrot.slane %v280_v60, 1  ;;  %v322_v7 = vadd.f32 %v321_v2, %v320_v58  ;;  %v288_v53 = vrot.slane %v287_v39, 1 }
  0x84   :  { %v295_v1 = vrot.slane %v294_v16, 1  ;;  %v302_v42 = vrot.slane %v301_v35, 1  ;;  %v309_v47 = vrot.slane %v308_v63, 1  ;;  %v316_v49 = vrot.slane %v315_v27, 1 }
  0x85   :  { %v2133_v55 = vadd.f32 %v274_v11, %v273_v30  ;;  %v2135_v40 = vadd.f32 %v281_v10, %v280_v60  ;;  %v323_v21 = vrot.slane %v322_v7, 1  ;;  %v2137_v4 = vadd.f32 %v288_v53, %v287_v39 }
  0x86   :  { %v2139_v43 = vadd.f32 %v295_v1, %v294_v16  ;;  %v2141_v50 = vadd.f32 %v302_v42, %v301_v35  ;;  %v2143_v45 = vadd.f32 %v309_v47, %v308_v63  ;;  %v2145_v28 = vadd.f32 %v316_v49, %v315_v27 }
  0x87   :  { %3345 = vst [vmem:[#allocation17_spill] sm:$0xff] %v2133_v55  ;;  %3346 = vst [vmem:[#allocation18_spill] sm:$0xff] %v2135_v40  ;;  %v2147_v36 = vadd.f32 %v323_v21, %v322_v7  ;;  %v325_v12 = vadd.f32 %v2083_v54, %v2079_v61  ;;  %v332_v13 = vadd.f32 %v2091_v48, %v2087_v41  ;;  %v3353_v54 = vld [vmem:[#allocation13_spill] sm:$0xff] }
  0x88   :  { %3347 = vst [vmem:[#allocation19_spill] sm:$0xff] %v2137_v4  ;;  %3348 = vst [vmem:[#allocation24_spill] sm:$0xff] %v2139_v43  ;;  %v339_v57 = vadd.f32 %v2099_v9, %v2095_v56  ;;  %v346_v14 = vadd.f32 %v2107_v46, %v2103_v44  ;;  %v353_v15 = vadd.f32 %v2115_v6, %v2111_v8  ;;  %v3354_v6 = vld [vmem:[#allocation15_spill] sm:$0xff] }
  0x89   :  { %3349 = vst [vmem:[#allocation20_spill] sm:$0xff] %v2141_v50  ;;  %3350 = vst [vmem:[#allocation21_spill] sm:$0xff] %v2143_v45  ;;  %v360_v58 = vadd.f32 %v2123_v52, %v2119_v5  ;;  %v326_v25 = vrot.slane %v325_v12, 4  ;;  %v333_v18 = vrot.slane %v332_v13, 4  ;;  %v367_v61 = vadd.f32 %v2131_v17, %v2127_v51  ;;  %v3375_v45 = vld [vmem:[#allocation36_spill] sm:$0xff] }
  0x8a   :  { %3351 = vst [vmem:[#allocation53_spill] sm:$0xff] %v2145_v28  ;;  %3352 = vst [vmem:[#allocation54_spill] sm:$0xff] %v2147_v36  ;;  %v2165_v41 = vmul.f32 %v3353_v54, %v1847_v19  ;;  %v340_v48 = vrot.slane %v339_v57, 4  ;;  %v347_v56 = vrot.slane %v346_v14, 4  ;;  %v354_v9 = vrot.slane %v353_v15, 4  ;;  %v3373_v36 = vld [vmem:[#allocation34_spill] sm:$0xff] }
  0x8b   :  { %v361_v22 = vrot.slane %v360_v58, 4  ;;  %v327_v44 = vadd.f32 %v326_v25, %v325_v12  ;;  %v334_v46 = vadd.f32 %v333_v18, %v332_v13  ;;  %v368_v26 = vrot.slane %v367_v61, 4  ;;  %v3374_v28 = vld [vmem:[#allocation35_spill] sm:$0xff] }
  0x8c   :  { %v377_v8 = vmul.f32 %v3354_v6, %v1853_v23  ;;  %v341_v52 = vadd.f32 %v340_v48, %v339_v57  ;;  %v348_v5 = vadd.f32 %v347_v56, %v346_v14  ;;  %v355_v30 = vadd.f32 %v354_v9, %v353_v15 }
  0x8d   :  { %v362_v60 = vadd.f32 %v361_v22, %v360_v58  ;;  %v328_v37 = vrot.slane %v327_v44, 2  ;;  %v335_v17 = vrot.slane %v334_v46, 2  ;;  %v369_v51 = vadd.f32 %v368_v26, %v367_v61 }
  0x8e   :  { %v378_v19 = vmul.f32 %v3353_v54, %v1849_v20  ;;  %v342_v2 = vrot.slane %v341_v52, 2  ;;  %v349_v39 = vrot.slane %v348_v5, 2  ;;  %v356_v16 = vrot.slane %v355_v30, 2 }
  0x8f   :  { %v363_v35 = vrot.slane %v362_v60, 2  ;;  %v329_v63 = vadd.f32 %v328_v37, %v327_v44  ;;  %v336_v11 = vadd.f32 %v335_v17, %v334_v46  ;;  %v370_v10 = vrot.slane %v369_v51, 2  ;;  %v3362_v17 = vld [vmem:[#allocation22_spill] sm:$0xff] }
  0x90   :  { %v379_v23 = vmul.f32 %v3354_v6, %v1855_v24  ;;  %v343_v27 = vadd.f32 %v342_v2, %v341_v52  ;;  %v350_v7 = vadd.f32 %v349_v39, %v348_v5  ;;  %v357_v53 = vadd.f32 %v356_v16, %v355_v30  ;;  %v3363_v2 = vld [vmem:[#allocation23_spill] sm:$0xff]  ;;  %v3364_v16 = vld [vmem:[#allocation25_spill] sm:$0xff] }
  0x91   :  { %v364_v1 = vadd.f32 %v363_v35, %v362_v60  ;;  %v330_v42 = vrot.slane %v329_v63, 1  ;;  %v337_v47 = vrot.slane %v336_v11, 1  ;;  %v371_v49 = vadd.f32 %v370_v10, %v369_v51  ;;  %v3366_v10 = vld [vmem:[#allocation27_spill] sm:$0xff] }
  0x92   :  { %v380_v21 = vmul.f32 %v3353_v54, %v1874_v31  ;;  %v344_v12 = vrot.slane %v343_v27, 1  ;;  %v351_v13 = vrot.slane %v350_v7, 1  ;;  %v358_v57 = vrot.slane %v357_v53, 1 }
  0x93   :  { %v365_v14 = vrot.slane %v364_v1, 1  ;;  %v2175_v15 = vadd.f32 %v330_v42, %v329_v63  ;;  %v2177_v58 = vadd.f32 %v337_v47, %v336_v11  ;;  %v372_v25 = vrot.slane %v371_v49, 1  ;;  %v3365_v63 = vld [vmem:[#allocation26_spill] sm:$0xff] }
  0x94   :  { %v381_v18 = vmul.f32 %v3354_v6, %v1876_v32  ;;  %v2181_v61 = vadd.f32 %v344_v12, %v343_v27  ;;  %v2183_v48 = vadd.f32 %v351_v13, %v350_v7  ;;  %v2185_v56 = vadd.f32 %v358_v57, %v357_v53  ;;  %v3367_v7 = vld [vmem:[#allocation28_spill] sm:$0xff]  ;;  %v3369_v47 = vld [vmem:[#allocation30_spill] sm:$0xff]  ;;  %v3370_v12 = vld [vmem:[#allocation31_spill] sm:$0xff] }
  0x95   :  { %3355 = vst [vmem:[#allocation13_spill] sm:$0xff] %v2175_v15  ;;  %3356 = vst [vmem:[#allocation15_spill] sm:$0xff] %v2177_v58  ;;  %v2187_v9 = vadd.f32 %v365_v14, %v364_v1  ;;  %v2189_v22 = vadd.f32 %v372_v25, %v371_v49  ;;  %v382_v44 = vmul.f32 %v3353_v54, %v1878_v33  ;;  %v3368_v1 = vld [vmem:[#allocation29_spill] sm:$0xff]  ;;  %v3371_v57 = vld [vmem:[#allocation32_spill] sm:$0xff] }
  0x96   :  { %3357 = vst [vmem:[#allocation55_spill] sm:$0xff] %v2181_v61  ;;  %3358 = vst [vmem:[#allocation56_spill] sm:$0xff] %v2183_v48  ;;  %v383_v46 = vmul.f32 %v3354_v6, %v1880_v34  ;;  %v384_v26 = vmul.f32 %v3353_v54, %v3325_v59  ;;  %v385_v52 = vmul.f32 %v3354_v6, %v3326_v38  ;;  %v3372_v25 = vld [vmem:[#allocation33_spill] sm:$0xff] }
  0x97   :  { %3359 = vst [vmem:[#allocation57_spill] sm:$0xff] %v2185_v56  ;;  %3360 = vst [vmem:[#allocation58_spill] sm:$0xff] %v2187_v9  ;;  %v386_v5 = vmul.f32 %v3353_v54, %v3327_v29  ;;  %v387_v30 = vmul.f32 %v3354_v6, %v3328_v62  ;;  %v388_v60 = vmul.f32 %v3353_v54, %v3329_v3 }
  0x98   :  { %3361 = vst [vmem:[#allocation59_spill] sm:$0xff] %v2189_v22  ;;  %v389_v37 = vmul.f32 %v3354_v6, %v3330_v0  ;;  %v390_v51 = vmul.f32 %v3353_v54, %v3362_v17  ;;  %v391_v39 = vmul.f32 %v3354_v6, %v3363_v2  ;;  %v2213_v35 = vmul.f32 %v3353_v54, %v3364_v16 }
  0x99   :  { %v2217_v11 = vmul.f32 %v3354_v6, %v3365_v63  ;;  %v2221_v27 = vmul.f32 %v3353_v54, %v3366_v10  ;;  %v2225_v53 = vmul.f32 %v3354_v6, %v3367_v7  ;;  %v2229_v42 = vmul.f32 %v3353_v54, %v3368_v1 }
  0x9a   :  { %v2233_v49 = vmul.f32 %v3354_v6, %v3369_v47  ;;  %v2237_v13 = vmul.f32 %v3353_v54, %v3370_v12  ;;  %v2241_v14 = vmul.f32 %v3354_v6, %v3371_v57  ;;  %v2245_v22 = vmul.f32 %v3353_v54, %v3372_v25 }
  0x9b   :  { %v2249_v9 = vmul.f32 %v3354_v6, %v3373_v36  ;;  %v2253_v56 = vmul.f32 %v3353_v54, %v3374_v28  ;;  %v2257_v48 = vmul.f32 %v3354_v6, %v3375_v45  ;;  %v404_v50 = vadd.f32 %v377_v8, %v2165_v41 }
  0x9c   :  { %v411_v61 = vadd.f32 %v379_v23, %v378_v19  ;;  %v418_v43 = vadd.f32 %v381_v18, %v380_v21  ;;  %v425_v58 = vadd.f32 %v383_v46, %v382_v44  ;;  %v432_v15 = vadd.f32 %v385_v52, %v384_v26 }
  0x9d   :  { %v405_v4 = vrot.slane %v404_v50, 4  ;;  %v439_v40 = vadd.f32 %v387_v30, %v386_v5  ;;  %v446_v55 = vadd.f32 %v389_v37, %v388_v60  ;;  %v453_v25 = vadd.f32 %v391_v39, %v390_v51 }
  0x9e   :  { %v412_v36 = vrot.slane %v411_v61, 4  ;;  %v419_v57 = vrot.slane %v418_v43, 4  ;;  %v426_v12 = vrot.slane %v425_v58, 4  ;;  %v433_v47 = vrot.slane %v432_v15, 4 }
  0x9f   :  { %v406_v54 = vadd.f32 %v405_v4, %v404_v50  ;;  %v440_v28 = vrot.slane %v439_v40, 4  ;;  %v447_v1 = vrot.slane %v446_v55, 4  ;;  %v454_v7 = vrot.slane %v453_v25, 4 }
  0xa0   :  { %v413_v6 = vadd.f32 %v412_v36, %v411_v61  ;;  %v420_v45 = vadd.f32 %v419_v57, %v418_v43  ;;  %v427_v10 = vadd.f32 %v426_v12, %v425_v58  ;;  %v434_v41 = vadd.f32 %v433_v47, %v432_v15 }
  0xa1   :  { %v407_v8 = vrot.slane %v406_v54, 2  ;;  %v441_v19 = vadd.f32 %v440_v28, %v439_v40  ;;  %v448_v23 = vadd.f32 %v447_v1, %v446_v55  ;;  %v455_v21 = vadd.f32 %v454_v7, %v453_v25 }
  0xa2   :  { %v414_v18 = vrot.slane %v413_v6, 2  ;;  %v421_v44 = vrot.slane %v420_v45, 2  ;;  %v428_v46 = vrot.slane %v427_v10, 2  ;;  %v435_v26 = vrot.slane %v434_v41, 2 }
  0xa3   :  { %v408_v52 = vadd.f32 %v407_v8, %v406_v54  ;;  %v442_v5 = vrot.slane %v441_v19, 2  ;;  %v449_v30 = vrot.slane %v448_v23, 2  ;;  %v456_v60 = vrot.slane %v455_v21, 2 }
  0xa4   :  { %v415_v4 = vadd.f32 %v414_v18, %v413_v6  ;;  %v422_v50 = vadd.f32 %v421_v44, %v420_v45  ;;  %v429_v37 = vadd.f32 %v428_v46, %v427_v10  ;;  %v436_v51 = vadd.f32 %v435_v26, %v434_v41  ;;  %v3384_v46 = vld [vmem:[#allocation14_spill] sm:$0xff] }
  0xa5   :  { %v409_v36 = vrot.slane %v408_v52, 1  ;;  %v443_v43 = vadd.f32 %v442_v5, %v441_v19  ;;  %v450_v58 = vadd.f32 %v449_v30, %v448_v23  ;;  %v457_v15 = vadd.f32 %v456_v60, %v455_v21 }
  0xa6   :  { %v416_v61 = vrot.slane %v415_v4, 1  ;;  %v423_v40 = vrot.slane %v422_v50, 1  ;;  %v430_v55 = vrot.slane %v429_v37, 1  ;;  %v437_v28 = vrot.slane %v436_v51, 1 }
  0xa7   :  { %v2260_v39 = vadd.f32 %v409_v36, %v408_v52  ;;  %v444_v7 = vrot.slane %v443_v43, 1  ;;  %v451_v1 = vrot.slane %v450_v58, 1  ;;  %v458_v47 = vrot.slane %v457_v15, 1 }
  0xa8   :  { %v2262_v12 = vadd.f32 %v416_v61, %v415_v4  ;;  %v2264_v57 = vadd.f32 %v423_v40, %v422_v50  ;;  %v2266_v45 = vadd.f32 %v430_v55, %v429_v37  ;;  %v2268_v10 = vadd.f32 %v437_v28, %v436_v51 }
  0xa9   :  { %3376 = vst [vmem:[#allocation22_spill] sm:$0xff] %v2260_v39  ;;  %v2270_v25 = vadd.f32 %v444_v7, %v443_v43  ;;  %v2272_v54 = vadd.f32 %v451_v1, %v450_v58  ;;  %v2274_v6 = vadd.f32 %v458_v47, %v457_v15  ;;  %v460_v41 = vadd.f32 %v2217_v11, %v2213_v35  ;;  %v3385_v35 = vld [vmem:[#allocation16_spill] sm:$0xff]  ;;  %v2457_v39 = vld [vmem:[#allocation2 + $0xb0] sm:$0xff] }
  0xaa   :  { %3377 = vst [vmem:[#allocation23_spill] sm:$0xff] %v2262_v12  ;;  %3378 = vst [vmem:[#allocation25_spill] sm:$0xff] %v2264_v57  ;;  %v467_v8 = vadd.f32 %v2225_v53, %v2221_v27  ;;  %v474_v19 = vadd.f32 %v2233_v49, %v2229_v42  ;;  %v481_v23 = vadd.f32 %v2241_v14, %v2237_v13 }
  0xab   :  { %3379 = vst [vmem:[#allocation26_spill] sm:$0xff] %v2266_v45  ;;  %3380 = vst [vmem:[#allocation60_spill] sm:$0xff] %v2268_v10  ;;  %v488_v21 = vadd.f32 %v2249_v9, %v2245_v22  ;;  %v461_v18 = vrot.slane %v460_v41, 4  ;;  %v495_v44 = vadd.f32 %v2257_v48, %v2253_v56  ;;  %v504_v26 = vmul.f32 %v3384_v46, %v1849_v20 }
  0xac   :  { %3381 = vst [vmem:[#allocation61_spill] sm:$0xff] %v2270_v25  ;;  %3382 = vst [vmem:[#allocation62_spill] sm:$0xff] %v2272_v54  ;;  %v505_v11 = vmul.f32 %v3385_v35, %v1855_v24  ;;  %v468_v27 = vrot.slane %v467_v8, 4  ;;  %v475_v53 = vrot.slane %v474_v19, 4  ;;  %v482_v52 = vrot.slane %v481_v23, 4 }
  0xad   :  { %3383 = vst [vmem:[#allocation63_spill] sm:$0xff] %v2274_v6  ;;  %v489_v42 = vrot.slane %v488_v21, 4  ;;  %v462_v49 = vadd.f32 %v461_v18, %v460_v41  ;;  %v496_v5 = vrot.slane %v495_v44, 4  ;;  %v506_v13 = vmul.f32 %v3384_v46, %v1874_v31  ;;  %v2479_v6 = vld [vmem:[#allocation2 + $0xc8] sm:$0xff] }
  0xae   :  { %v507_v9 = vmul.f32 %v3385_v35, %v1876_v32  ;;  %v469_v22 = vadd.f32 %v468_v27, %v467_v8  ;;  %v476_v48 = vadd.f32 %v475_v53, %v474_v19  ;;  %v483_v56 = vadd.f32 %v482_v52, %v481_v23  ;;  %v3392_v53 = vld [vmem:[#allocation27_spill] sm:$0xff] }
  0xaf   :  { %v490_v14 = vadd.f32 %v489_v42, %v488_v21  ;;  %v463_v20 = vrot.slane %v462_v49, 2  ;;  %v497_v30 = vadd.f32 %v496_v5, %v495_v44  ;;  %v508_v24 = vmul.f32 %v3384_v46, %v1878_v33  ;;  %v3393_v42 = vld [vmem:[#allocation28_spill] sm:$0xff]  ;;  %v3394_v5 = vld [vmem:[#allocation29_spill] sm:$0xff] }
  0xb0   :  { %v509_v60 = vmul.f32 %v3385_v35, %v1880_v34  ;;  %v470_v4 = vrot.slane %v469_v22, 2  ;;  %v477_v50 = vrot.slane %v476_v48, 2  ;;  %v484_v37 = vrot.slane %v483_v56, 2 }
  0xb1   :  { %v491_v51 = vrot.slane %v490_v14, 2  ;;  %v464_v31 = vadd.f32 %v463_v20, %v462_v49  ;;  %v498_v36 = vrot.slane %v497_v30, 2  ;;  %v510_v32 = vmul.f32 %v3384_v46, %v3325_v59 }
  0xb2   :  { %v511_v43 = vmul.f32 %v3385_v35, %v3326_v38  ;;  %v471_v58 = vadd.f32 %v470_v4, %v469_v22  ;;  %v478_v15 = vadd.f32 %v477_v50, %v476_v48  ;;  %v485_v61 = vadd.f32 %v484_v37, %v483_v56  ;;  %v3395_v22 = vld [vmem:[#allocation30_spill] sm:$0xff]  ;;  %v3400_v50 = vld [vmem:[#allocation35_spill] sm:$0xff] }
  0xb3   :  { %v492_v40 = vadd.f32 %v491_v51, %v490_v14  ;;  %v465_v33 = vrot.slane %v464_v31, 1  ;;  %v499_v55 = vadd.f32 %v498_v36, %v497_v30  ;;  %v512_v34 = vmul.f32 %v3384_v46, %v3327_v29  ;;  %v3398_v14 = vld [vmem:[#allocation33_spill] sm:$0xff]  ;;  %v3399_v30 = vld [vmem:[#allocation34_spill] sm:$0xff]  ;;  %v3401_v51 = vld [vmem:[#allocation36_spill] sm:$0xff] }
  0xb4   :  { %v513_v28 = vmul.f32 %v3385_v35, %v3328_v62  ;;  %v472_v7 = vrot.slane %v471_v58, 1  ;;  %v479_v1 = vrot.slane %v478_v15, 1  ;;  %v486_v47 = vrot.slane %v485_v61, 1 }
  0xb5   :  { %v493_v41 = vrot.slane %v492_v40, 1  ;;  %v2308_v59 = vadd.f32 %v465_v33, %v464_v31  ;;  %v500_v8 = vrot.slane %v499_v55, 1  ;;  %v514_v38 = vmul.f32 %v3384_v46, %v3329_v3 }
  0xb6   :  { %v515_v19 = vmul.f32 %v3385_v35, %v3330_v0  ;;  %v2314_v23 = vadd.f32 %v472_v7, %v471_v58  ;;  %v2316_v21 = vadd.f32 %v479_v1, %v478_v15  ;;  %v2318_v29 = vadd.f32 %v486_v47, %v485_v61 }
  0xb7   :  { %3386 = vst [vmem:[#allocation14_spill] sm:$0xff] %v2308_v59  ;;  %v2320_v62 = vadd.f32 %v493_v41, %v492_v40  ;;  %v2322_v18 = vadd.f32 %v500_v8, %v499_v55  ;;  %v516_v44 = vmul.f32 %v3384_v46, %v3362_v17  ;;  %v517_v27 = vmul.f32 %v3385_v35, %v3363_v2 }
  0xb8   :  { %3387 = vst [vmem:[#allocation16_spill] sm:$0xff] %v2314_v23  ;;  %3388 = vst [vmem:[#allocation64_spill] sm:$0xff] %v2316_v21  ;;  %v518_v3 = vmul.f32 %v3384_v46, %v3364_v16  ;;  %v519_v0 = vmul.f32 %v3385_v35, %v3365_v63  ;;  %v2334_v52 = vmul.f32 %v3384_v46, %v3392_v53  ;;  %v3396_v16 = vld [vmem:[#allocation31_spill] sm:$0xff]  ;;  %v3397_v63 = vld [vmem:[#allocation32_spill] sm:$0xff] }
  0xb9   :  { %3389 = vst [vmem:[#allocation65_spill] sm:$0xff] %v2318_v29  ;;  %3390 = vst [vmem:[#allocation66_spill] sm:$0xff] %v2320_v62  ;;  %v2338_v49 = vmul.f32 %v3385_v35, %v3393_v42  ;;  %v2342_v17 = vmul.f32 %v3384_v46, %v3394_v5  ;;  %v2346_v2 = vmul.f32 %v3385_v35, %v3395_v22 }
  0xba   :  { %3391 = vst [vmem:[#allocation67_spill] sm:$0xff] %v2322_v18  ;;  %v2350_v48 = vmul.f32 %v3384_v46, %v3396_v16  ;;  %v2354_v56 = vmul.f32 %v3385_v35, %v3397_v63  ;;  %v2358_v20 = vmul.f32 %v3384_v46, %v3398_v14  ;;  %v527_v4 = vmul.f32 %v3385_v35, %v3399_v30 }
  0xbb   :  { %v528_v37 = vmul.f32 %v3384_v46, %v3400_v50  ;;  %v529_v31 = vmul.f32 %v3385_v35, %v3401_v51  ;;  %v530_v36 = vadd.f32 %v505_v11, %v504_v26  ;;  %v537_v58 = vadd.f32 %v507_v9, %v506_v13 }
  0xbc   :  { %v544_v15 = vadd.f32 %v509_v60, %v508_v24  ;;  %v551_v61 = vadd.f32 %v511_v43, %v510_v32  ;;  %v558_v40 = vadd.f32 %v513_v28, %v512_v34  ;;  %v565_v55 = vadd.f32 %v515_v19, %v514_v38 }
  0xbd   :  { %v531_v33 = vrot.slane %v530_v36, 4  ;;  %v572_v7 = vadd.f32 %v517_v27, %v516_v44  ;;  %v579_v1 = vadd.f32 %v519_v0, %v518_v3  ;;  %v538_v47 = vrot.slane %v537_v58, 4 }
  0xbe   :  { %v545_v41 = vrot.slane %v544_v15, 4  ;;  %v552_v8 = vrot.slane %v551_v61, 4  ;;  %v559_v53 = vrot.slane %v558_v40, 4  ;;  %v566_v5 = vrot.slane %v565_v55, 4 }
  0xbf   :  { %v532_v42 = vadd.f32 %v531_v33, %v530_v36  ;;  %v573_v22 = vrot.slane %v572_v7, 4  ;;  %v580_v46 = vrot.slane %v579_v1, 4  ;;  %v539_v16 = vadd.f32 %v538_v47, %v537_v58 }
  0xc0   :  { %v546_v63 = vadd.f32 %v545_v41, %v544_v15  ;;  %v553_v35 = vadd.f32 %v552_v8, %v551_v61  ;;  %v560_v26 = vadd.f32 %v559_v53, %v558_v40  ;;  %v567_v13 = vadd.f32 %v566_v5, %v565_v55 }
  0xc1   :  { %v533_v11 = vrot.slane %v532_v42, 2  ;;  %v574_v9 = vadd.f32 %v573_v22, %v572_v7  ;;  %v581_v24 = vadd.f32 %v580_v46, %v579_v1  ;;  %v540_v60 = vrot.slane %v539_v16, 2 }
  0xc2   :  { %v547_v32 = vrot.slane %v546_v63, 2  ;;  %v554_v43 = vrot.slane %v553_v35, 2  ;;  %v561_v34 = vrot.slane %v560_v26, 2  ;;  %v568_v38 = vrot.slane %v567_v13, 2 }
  0xc3   :  { %v534_v28 = vadd.f32 %v533_v11, %v532_v42  ;;  %v575_v19 = vrot.slane %v574_v9, 2  ;;  %v582_v44 = vrot.slane %v581_v24, 2  ;;  %v541_v27 = vadd.f32 %v540_v60, %v539_v16  ;;  %v1690_v60 = vld [vmem:[#allocation2 + $0x48] sm:$0xff] }
  0xc4   :  { %v548_v3 = vadd.f32 %v547_v32, %v546_v63  ;;  %v555_v0 = vadd.f32 %v554_v43, %v553_v35  ;;  %v562_v14 = vadd.f32 %v561_v34, %v560_v26  ;;  %v569_v50 = vadd.f32 %v568_v38, %v567_v13  ;;  %v1689_v13 = vld [vmem:[#allocation2 + $0x40] sm:$0xff]  ;;  %v2395_v34 = vld [vmem:[#allocation2 + $0x50] sm:$0xff] }
  0xc5   :  { %v535_v30 = vrot.slane %v534_v28, 1  ;;  %v576_v51 = vadd.f32 %v575_v19, %v574_v9  ;;  %v583_v36 = vadd.f32 %v582_v44, %v581_v24  ;;  %v542_v58 = vrot.slane %v541_v27, 1  ;;  %v3410_v9 = vld [vmem:[#allocation11_spill] sm:$0xff]  ;;  %v3411_v32 = vld [vmem:[#allocation12_spill] sm:$0xff] }
  0xc6   :  { %v549_v15 = vrot.slane %v548_v3, 1  ;;  %v556_v61 = vrot.slane %v555_v0, 1  ;;  %v563_v40 = vrot.slane %v562_v14, 1  ;;  %v570_v55 = vrot.slane %v569_v50, 1 }
  0xc7   :  { %v2366_v33 = vadd.f32 %v535_v30, %v534_v28  ;;  %v577_v7 = vrot.slane %v576_v51, 1  ;;  %v584_v1 = vrot.slane %v583_v36, 1  ;;  %v2368_v47 = vadd.f32 %v542_v58, %v541_v27  ;;  %v2411_v27 = vld [vmem:[#allocation2 + $0x58] sm:$0xff]  ;;  %v2419_v30 = vld [vmem:[#allocation2 + $0x68] sm:$0xff] }
  0xc8   :  { %v2370_v41 = vadd.f32 %v549_v15, %v548_v3  ;;  %v2372_v8 = vadd.f32 %v556_v61, %v555_v0  ;;  %v2374_v53 = vadd.f32 %v563_v40, %v562_v14  ;;  %v2376_v42 = vadd.f32 %v570_v55, %v569_v50  ;;  %v2415_v0 = vld [vmem:[#allocation2 + $0x60] sm:$0xff]  ;;  %v2423_v40 = vld [vmem:[#allocation2 + $0x70] sm:$0xff] }
  0xc9   :  { %3402 = vst [vmem:[#allocation27_spill] sm:$0xff] %v2366_v33  ;;  %3403 = vst [vmem:[#allocation28_spill] sm:$0xff] %v2368_v47  ;;  %v2378_v5 = vadd.f32 %v577_v7, %v576_v51  ;;  %v2380_v22 = vadd.f32 %v584_v1, %v583_v36  ;;  %v586_v46 = vadd.f32 %v2338_v49, %v2334_v52  ;;  %v2427_v7 = vld [vmem:[#allocation2 + $0x78] sm:$0xff] }
  0xca   :  { %3404 = vst [vmem:[#allocation29_spill] sm:$0xff] %v2370_v41  ;;  %3405 = vst [vmem:[#allocation30_spill] sm:$0xff] %v2372_v8  ;;  %v593_v16 = vadd.f32 %v2346_v2, %v2342_v17  ;;  %v600_v63 = vadd.f32 %v2354_v56, %v2350_v48  ;;  %v607_v35 = vadd.f32 %v527_v4, %v2358_v20  ;;  %v2473_v41 = vld [vmem:[#allocation2 + $0xc0] sm:$0xff] }
  0xcb   :  { %3406 = vst [vmem:[#allocation31_spill] sm:$0xff] %v2374_v53  ;;  %3407 = vst [vmem:[#allocation32_spill] sm:$0xff] %v2376_v42  ;;  %v614_v26 = vadd.f32 %v529_v31, %v528_v37  ;;  %v587_v11 = vrot.slane %v586_v46, 4  ;;  %v2390_v24 = vmul.f32 %v1689_v13, %v3410_v9  ;;  %v2393_v43 = vmul.f32 %v1690_v60, %v3411_v32 }
  0xcc   :  { %3408 = vst [vmem:[#allocation33_spill] sm:$0xff] %v2378_v5  ;;  %3409 = vst [vmem:[#allocation34_spill] sm:$0xff] %v2380_v22  ;;  %v2399_v52 = vmul.f32 %v2395_v34, %v3410_v9  ;;  %v594_v49 = vrot.slane %v593_v16, 4  ;;  %v601_v17 = vrot.slane %v600_v63, 4  ;;  %v608_v2 = vrot.slane %v607_v35, 4 }
  0xcd   :  { %v615_v48 = vrot.slane %v614_v26, 4  ;;  %v588_v56 = vadd.f32 %v587_v11, %v586_v46  ;;  %v2402_v20 = vmul.f32 %v1689_v13, %v2390_v24  ;;  %v2405_v4 = vmul.f32 %v1690_v60, %v2393_v43  ;;  %v2431_v46 = vld [vmem:[#allocation2 + $0x80] sm:$0xff]  ;;  %v2435_v60 = vld [vmem:[#allocation2 + $0x88] sm:$0xff] }
  0xce   :  { %v2409_v37 = vmul.f32 %v2395_v34, %v2390_v24  ;;  %v595_v31 = vadd.f32 %v594_v49, %v593_v16  ;;  %v602_v28 = vadd.f32 %v601_v17, %v600_v63  ;;  %v609_v38 = vadd.f32 %v608_v2, %v607_v35  ;;  %v2439_v17 = vld [vmem:[#allocation2 + $0x90] sm:$0xff] }
  0xcf   :  { %v616_v19 = vadd.f32 %v615_v48, %v614_v26  ;;  %v589_v44 = vrot.slane %v588_v56, 2  ;;  %v626_v3 = vmul.f32 %v2411_v27, %v2393_v43  ;;  %v627_v14 = vmul.f32 %v2415_v0, %v2390_v24  ;;  %v2443_v48 = vld [vmem:[#allocation2 + $0x98] sm:$0xff] }
  0xd0   :  { %v628_v50 = vmul.f32 %v2419_v30, %v2393_v43  ;;  %v596_v51 = vrot.slane %v595_v31, 2  ;;  %v603_v36 = vrot.slane %v602_v28, 2  ;;  %v610_v58 = vrot.slane %v609_v38, 2 }
  0xd1   :  { %v617_v15 = vrot.slane %v616_v19, 2  ;;  %v590_v61 = vadd.f32 %v589_v44, %v588_v56  ;;  %v629_v55 = vmul.f32 %v2423_v40, %v2390_v24  ;;  %v630_v1 = vmul.f32 %v2427_v7, %v2393_v43 }
  0xd2   :  { %v631_v16 = vmul.f32 %v2431_v46, %v2390_v24  ;;  %v597_v63 = vadd.f32 %v596_v51, %v595_v31  ;;  %v604_v35 = vadd.f32 %v603_v36, %v602_v28  ;;  %v611_v26 = vadd.f32 %v610_v58, %v609_v38  ;;  %v2449_v51 = vld [vmem:[#allocation2 + $0xa0] sm:$0xff]  ;;  %v2453_v58 = vld [vmem:[#allocation2 + $0xa8] sm:$0xff] }
  0xd3   :  { %v618_v11 = vadd.f32 %v617_v15, %v616_v19  ;;  %v591_v13 = vrot.slane %v590_v61, 1  ;;  %v632_v49 = vmul.f32 %v2435_v60, %v2393_v43  ;;  %v633_v2 = vmul.f32 %v2439_v17, %v2390_v24 }
  0xd4   :  { %v634_v56 = vmul.f32 %v2443_v48, %v2393_v43  ;;  %v598_v31 = vrot.slane %v597_v63, 1  ;;  %v605_v28 = vrot.slane %v604_v35, 1  ;;  %v612_v38 = vrot.slane %v611_v26, 1 }
  0xd5   :  { %v619_v19 = vrot.slane %v618_v11, 1  ;;  %v2447_v44 = vadd.f32 %v591_v13, %v590_v61  ;;  %v635_v36 = vmul.f32 %v2449_v51, %v2390_v24  ;;  %v636_v15 = vmul.f32 %v2453_v58, %v2393_v43 }
  0xd6   :  { %v637_v22 = vmul.f32 %v2457_v39, %v2390_v24  ;;  %v2461_v5 = vadd.f32 %v598_v31, %v597_v63  ;;  %v2463_v59 = vadd.f32 %v605_v28, %v604_v35  ;;  %v2465_v61 = vadd.f32 %v612_v38, %v611_v26  ;;  %v2485_v35 = vld [vmem:[#allocation2 + $0xd0] sm:$0xff]  ;;  %v2497_v28 = vld [vmem:[#allocation2 + $0xe0] sm:$0xff] }
  0xd7   :  { %3412 = vst [vmem:[#allocation35_spill] sm:$0xff] %v2447_v44  ;;  %v2467_v13 = vadd.f32 %v619_v19, %v618_v11  ;;  %v2469_v44 = vld [vmem:[#allocation2 + $0xb8] sm:$0xff]  ;;  %v2477_v18 = vmul.f32 %v2473_v41, %v2390_v24  ;;  %v2483_v63 = vmul.f32 %v2479_v6, %v2393_v43  ;;  %v2489_v26 = vmul.f32 %v2485_v35, %v2390_v24  ;;  %v2503_v19 = vld [vmem:[#allocation2 + $0xe8] sm:$0xff] }
  0xd8   :  { %3413 = vst [vmem:[#allocation36_spill] sm:$0xff] %v2461_v5  ;;  %3414 = vst [vmem:[#allocation68_spill] sm:$0xff] %v2463_v59  ;;  %v638_v42 = vmul.f32 %v2469_v44, %v2393_v43  ;;  %v2491_v11 = vld [vmem:[#allocation2 + $0xd8] sm:$0xff]  ;;  %v2501_v38 = vmul.f32 %v2497_v28, %v2390_v24  ;;  %v2507_v59 = vmul.f32 %v2503_v19, %v2393_v43  ;;  %v2509_v5 = vld [vmem:[#allocation2 + $0xf0] sm:$0xff] }
  0xd9   :  { %3415 = vst [vmem:[#allocation69_spill] sm:$0xff] %v2465_v61  ;;  %3416 = vst [vmem:[#allocation70_spill] sm:$0xff] %v2467_v13  ;;  %v2495_v31 = vmul.f32 %v2491_v11, %v2393_v43  ;;  %v645_v13 = vmul.f32 %v2509_v5, %v2390_v24  ;;  %v2513_v61 = vld [vmem:[#allocation2 + $0xf8] sm:$0xff]  ;;  %v647_v8 = vadd.f32 %v2405_v4, %v2402_v20 }
  0xda   :  { %3417 = vst [vmem:[#allocation71_spill] sm:$0xff] %v2503_v19  ;;  %3418 = vst [vmem:[#allocation72_spill] sm:$0xff] %v2509_v5  ;;  %v646_v53 = vmul.f32 %v2513_v61, %v2393_v43  ;;  %v654_v47 = vadd.f32 %v626_v3, %v2409_v37  ;;  %v661_v33 = vadd.f32 %v628_v50, %v627_v14 }
  0xdb   :  { %3419 = vst [vmem:[#allocation73_spill] sm:$0xff] %v2513_v61  ;;  %v668_v62 = vadd.f32 %v630_v1, %v629_v55  ;;  %v675_v54 = vadd.f32 %v632_v49, %v631_v16  ;;  %v682_v29 = vadd.f32 %v634_v56, %v633_v2  ;;  %v689_v25 = vadd.f32 %v636_v15, %v635_v36 }
  0xdc   :  { %v648_v21 = vrot.slane %v647_v8, 4  ;;  %v655_v23 = vrot.slane %v654_v47, 4  ;;  %v662_v10 = vrot.slane %v661_v33, 4  ;;  %v696_v45 = vadd.f32 %v638_v42, %v637_v22 }
  0xdd   :  { %v669_v24 = vrot.slane %v668_v62, 4  ;;  %v676_v57 = vrot.slane %v675_v54, 4  ;;  %v683_v12 = vrot.slane %v682_v29, 4  ;;  %v690_v9 = vrot.slane %v689_v25, 4 }
  0xde   :  { %v649_v5 = vadd.f32 %v648_v21, %v647_v8  ;;  %v656_v43 = vadd.f32 %v655_v23, %v654_v47  ;;  %v663_v61 = vadd.f32 %v662_v10, %v661_v33  ;;  %v697_v19 = vrot.slane %v696_v45, 4 }
  0xdf   :  { %v670_v20 = vadd.f32 %v669_v24, %v668_v62  ;;  %v677_v4 = vadd.f32 %v676_v57, %v675_v54  ;;  %v684_v37 = vadd.f32 %v683_v12, %v682_v29  ;;  %v691_v3 = vadd.f32 %v690_v9, %v689_v25 }
  0xe0   :  { %v650_v14 = vrot.slane %v649_v5, 2  ;;  %v657_v50 = vrot.slane %v656_v43, 2  ;;  %v664_v55 = vrot.slane %v663_v61, 2  ;;  %v698_v1 = vadd.f32 %v697_v19, %v696_v45 }
  0xe1   :  { %v671_v16 = vrot.slane %v670_v20, 2  ;;  %v678_v49 = vrot.slane %v677_v4, 2  ;;  %v685_v2 = vrot.slane %v684_v37, 2  ;;  %v692_v42 = vrot.slane %v691_v3, 2 }
  0xe2   :  { %v651_v22 = vadd.f32 %v650_v14, %v649_v5  ;;  %v658_v56 = vadd.f32 %v657_v50, %v656_v43  ;;  %v665_v36 = vadd.f32 %v664_v55, %v663_v61  ;;  %v699_v15 = vrot.slane %v698_v1, 2 }
  0xe3   :  { %v672_v21 = vadd.f32 %v671_v16, %v670_v20  ;;  %v679_v23 = vadd.f32 %v678_v49, %v677_v4  ;;  %v686_v10 = vadd.f32 %v685_v2, %v684_v37  ;;  %v693_v33 = vadd.f32 %v692_v42, %v691_v3 }
  0xe4   :  { %v652_v62 = vrot.slane %v651_v22, 1  ;;  %v659_v57 = vrot.slane %v658_v56, 1  ;;  %v666_v12 = vrot.slane %v665_v36, 1  ;;  %v700_v25 = vadd.f32 %v699_v15, %v698_v1 }
  0xe5   :  { %v673_v54 = vrot.slane %v672_v21, 1  ;;  %v680_v29 = vrot.slane %v679_v23, 1  ;;  %v687_v47 = vrot.slane %v686_v10, 1  ;;  %v694_v45 = vrot.slane %v693_v33, 1 }
  0xe6   :  { %v2520_v8 = vadd.f32 %v652_v62, %v651_v22  ;;  %v2522_v9 = vadd.f32 %v659_v57, %v658_v56  ;;  %v2524_v5 = vadd.f32 %v666_v12, %v665_v36  ;;  %v701_v61 = vrot.slane %v700_v25, 1 }
  0xe7   :  { %v2526_v19 = vadd.f32 %v673_v54, %v672_v21  ;;  %v2528_v24 = vadd.f32 %v680_v29, %v679_v23  ;;  %v2530_v43 = vadd.f32 %v687_v47, %v686_v10  ;;  %v2532_v20 = vadd.f32 %v694_v45, %v693_v33 }
  0xe8   :  { %3420 = vst [vmem:[#allocation74_spill] sm:$0xff] %v2520_v8  ;;  %3421 = vst [vmem:[#allocation75_spill] sm:$0xff] %v2522_v9  ;;  %v2534_v4 = vadd.f32 %v701_v61, %v700_v25  ;;  %v703_v37 = vadd.f32 %v2483_v63, %v2477_v18  ;;  %v710_v3 = vadd.f32 %v2495_v31, %v2489_v26 }
  0xe9   :  { %3422 = vst [vmem:[#allocation76_spill] sm:$0xff] %v2524_v5  ;;  %3423 = vst [vmem:[#allocation77_spill] sm:$0xff] %v2526_v19  ;;  %v717_v14 = vadd.f32 %v2507_v59, %v2501_v38  ;;  %v724_v50 = vadd.f32 %v646_v53, %v645_v13  ;;  %v732_v55 = vmul.f32 %v2411_v27, %v3411_v32 }
  0xea   :  { %3424 = vst [vmem:[#allocation78_spill] sm:$0xff] %v2528_v24  ;;  %3425 = vst [vmem:[#allocation79_spill] sm:$0xff] %v2530_v43  ;;  %v733_v1 = vmul.f32 %v2395_v34, %v2399_v52  ;;  %v735_v16 = vmul.f32 %v2415_v0, %v2399_v52  ;;  %v704_v49 = vrot.slane %v703_v37, 4  ;;  %v711_v2 = vrot.slane %v710_v3, 4 }
  0xeb   :  { %3426 = vst [vmem:[#allocation80_spill] sm:$0xff] %v2532_v20  ;;  %3427 = vst [vmem:[#allocation81_spill] sm:$0xff] %v2534_v4  ;;  %v718_v42 = vrot.slane %v717_v14, 4  ;;  %v737_v18 = vmul.f32 %v2423_v40, %v2399_v52  ;;  %v725_v63 = vrot.slane %v724_v50, 4  ;;  %v734_v26 = vmul.f32 %v2411_v27, %v732_v55 }
  0xec   :  { %v736_v59 = vmul.f32 %v2419_v30, %v732_v55  ;;  %v738_v53 = vmul.f32 %v2427_v7, %v732_v55  ;;  %v705_v13 = vadd.f32 %v704_v49, %v703_v37  ;;  %v712_v31 = vadd.f32 %v711_v2, %v710_v3 }
  0xed   :  { %v719_v38 = vadd.f32 %v718_v42, %v717_v14  ;;  %v739_v34 = vmul.f32 %v2431_v46, %v2399_v52  ;;  %v726_v22 = vadd.f32 %v725_v63, %v724_v50  ;;  %v740_v56 = vmul.f32 %v2435_v60, %v732_v55  ;;  %v3428_v63 = vld [vmem:[#allocation71_spill] sm:$0xff] }
  0xee   :  { %v741_v36 = vmul.f32 %v2439_v17, %v2399_v52  ;;  %v742_v15 = vmul.f32 %v2443_v48, %v732_v55  ;;  %v706_v21 = vrot.slane %v705_v13, 2  ;;  %v713_v27 = vrot.slane %v712_v31, 2 }
  0xef   :  { %v720_v23 = vrot.slane %v719_v38, 2  ;;  %v743_v10 = vmul.f32 %v2449_v51, %v2399_v52  ;;  %v727_v33 = vrot.slane %v726_v22, 2  ;;  %v744_v62 = vmul.f32 %v2453_v58, %v732_v55 }
  0xf0   :  { %v745_v57 = vmul.f32 %v2457_v39, %v2399_v52  ;;  %v746_v12 = vmul.f32 %v2469_v44, %v732_v55  ;;  %v707_v25 = vadd.f32 %v706_v21, %v705_v13  ;;  %v714_v54 = vadd.f32 %v713_v27, %v712_v31  ;;  %v3429_v31 = vld [vmem:[#allocation72_spill] sm:$0xff] }
  0xf1   :  { %v721_v29 = vadd.f32 %v720_v23, %v719_v38  ;;  %v747_v47 = vmul.f32 %v2473_v41, %v2399_v52  ;;  %v728_v45 = vadd.f32 %v727_v33, %v726_v22  ;;  %v748_v61 = vmul.f32 %v2479_v6, %v732_v55  ;;  %v3430_v22 = vld [vmem:[#allocation73_spill] sm:$0xff] }
  0xf2   :  { %v2570_v37 = vmul.f32 %v2485_v35, %v2399_v52  ;;  %v2573_v3 = vmul.f32 %v2491_v11, %v732_v55  ;;  %v708_v14 = vrot.slane %v707_v25, 1  ;;  %v715_v50 = vrot.slane %v714_v54, 1 }
  0xf3   :  { %v722_v49 = vrot.slane %v721_v29, 1  ;;  %v2577_v2 = vmul.f32 %v2497_v28, %v2399_v52  ;;  %v729_v42 = vrot.slane %v728_v45, 1  ;;  %v2580_v13 = vmul.f32 %v3428_v63, %v732_v55 }
  0xf4   :  { %v2584_v38 = vmul.f32 %v3429_v31, %v2399_v52  ;;  %v2587_v21 = vmul.f32 %v3430_v22, %v732_v55  ;;  %v2589_v27 = vadd.f32 %v708_v14, %v707_v25  ;;  %v2591_v23 = vadd.f32 %v715_v50, %v714_v54 }
  0xf5   :  { %v2593_v33 = vadd.f32 %v722_v49, %v721_v29  ;;  %v755_v43 = vadd.f32 %v734_v26, %v733_v1  ;;  %v2595_v24 = vadd.f32 %v729_v42, %v728_v45  ;;  %v762_v19 = vadd.f32 %v736_v59, %v735_v16 }
  0xf6   :  { %3431 = vst [vmem:[#allocation82_spill] sm:$0xff] %v2589_v27  ;;  %3432 = vst [vmem:[#allocation83_spill] sm:$0xff] %v2591_v23  ;;  %v769_v4 = vadd.f32 %v738_v53, %v737_v18  ;;  %v776_v20 = vadd.f32 %v740_v56, %v739_v34  ;;  %v783_v9 = vadd.f32 %v742_v15, %v741_v36 }
  0xf7   :  { %3433 = vst [vmem:[#allocation84_spill] sm:$0xff] %v2593_v33  ;;  %3434 = vst [vmem:[#allocation85_spill] sm:$0xff] %v2595_v24  ;;  %v756_v5 = vrot.slane %v755_v43, 4  ;;  %v790_v8 = vadd.f32 %v744_v62, %v743_v10  ;;  %v797_v52 = vadd.f32 %v746_v12, %v745_v57  ;;  %v763_v31 = vrot.slane %v762_v19, 4 }
  0xf8   :  { %v770_v63 = vrot.slane %v769_v4, 4  ;;  %v777_v55 = vrot.slane %v776_v20, 4  ;;  %v804_v22 = vadd.f32 %v748_v61, %v747_v47  ;;  %v784_v14 = vrot.slane %v783_v9, 4 }
  0xf9   :  { %v757_v25 = vadd.f32 %v756_v5, %v755_v43  ;;  %v791_v54 = vrot.slane %v790_v8, 4  ;;  %v798_v50 = vrot.slane %v797_v52, 4  ;;  %v764_v29 = vadd.f32 %v763_v31, %v762_v19 }
  0xfa   :  { %v771_v49 = vadd.f32 %v770_v63, %v769_v4  ;;  %v778_v1 = vadd.f32 %v777_v55, %v776_v20  ;;  %v805_v26 = vrot.slane %v804_v22, 4  ;;  %v785_v16 = vadd.f32 %v784_v14, %v783_v9 }
  0xfb   :  { %v758_v45 = vrot.slane %v757_v25, 2  ;;  %v792_v18 = vadd.f32 %v791_v54, %v790_v8  ;;  %v799_v59 = vadd.f32 %v798_v50, %v797_v52  ;;  %v765_v53 = vrot.slane %v764_v29, 2 }
  0xfc   :  { %v772_v34 = vrot.slane %v771_v49, 2  ;;  %v779_v56 = vrot.slane %v778_v1, 2  ;;  %v806_v36 = vadd.f32 %v805_v26, %v804_v22  ;;  %v786_v10 = vrot.slane %v785_v16, 2 }
  0xfd   :  { %v759_v15 = vadd.f32 %v758_v45, %v757_v25  ;;  %v793_v62 = vrot.slane %v792_v18, 2  ;;  %v800_v57 = vrot.slane %v799_v59, 2  ;;  %v766_v5 = vadd.f32 %v765_v53, %v764_v29 }
  0xfe   :  { %v773_v43 = vadd.f32 %v772_v34, %v771_v49  ;;  %v780_v12 = vadd.f32 %v779_v56, %v778_v1  ;;  %v807_v47 = vrot.slane %v806_v36, 2  ;;  %v787_v4 = vadd.f32 %v786_v10, %v785_v16 }
  0xff   :  { %v760_v19 = vrot.slane %v759_v15, 1  ;;  %v794_v20 = vadd.f32 %v793_v62, %v792_v18  ;;  %v801_v61 = vadd.f32 %v800_v57, %v799_v59  ;;  %v767_v42 = vrot.slane %v766_v5, 1  ;;  %v3443_v59 = vld [vmem:[#allocation11_spill] sm:$0xff] }
 0x100   :  { %v774_v9 = vrot.slane %v773_v43, 1  ;;  %v781_v8 = vrot.slane %v780_v12, 1  ;;  %v808_v63 = vadd.f32 %v807_v47, %v806_v36  ;;  %v788_v52 = vrot.slane %v787_v4, 1 }
 0x101   :  { %v2597_v31 = vadd.f32 %v760_v19, %v759_v15  ;;  %v795_v22 = vrot.slane %v794_v20, 1  ;;  %v802_v55 = vrot.slane %v801_v61, 1  ;;  %v2599_v25 = vadd.f32 %v767_v42, %v766_v5 }
 0x102   :  { %v2601_v14 = vadd.f32 %v774_v9, %v773_v43  ;;  %v2603_v54 = vadd.f32 %v781_v8, %v780_v12  ;;  %v809_v50 = vrot.slane %v808_v63, 1  ;;  %v2605_v29 = vadd.f32 %v788_v52, %v787_v4 }
 0x103   :  { %3435 = vst [vmem:[#allocation86_spill] sm:$0xff] %v2597_v31  ;;  %3436 = vst [vmem:[#allocation87_spill] sm:$0xff] %v2599_v25  ;;  %v2607_v49 = vadd.f32 %v795_v22, %v794_v20  ;;  %v2609_v1 = vadd.f32 %v802_v55, %v801_v61  ;;  %v811_v26 = vadd.f32 %v2573_v3, %v2570_v37 }
 0x104   :  { %3437 = vst [vmem:[#allocation88_spill] sm:$0xff] %v2601_v14  ;;  %3438 = vst [vmem:[#allocation89_spill] sm:$0xff] %v2603_v54  ;;  %v2613_v45 = vadd.f32 %v809_v50, %v808_v63  ;;  %v818_v16 = vadd.f32 %v2580_v13, %v2577_v2  ;;  %v825_v18 = vadd.f32 %v2587_v21, %v2584_v38 }
 0x105   :  { %3439 = vst [vmem:[#allocation90_spill] sm:$0xff] %v2605_v29  ;;  %3440 = vst [vmem:[#allocation91_spill] sm:$0xff] %v2607_v49  ;;  %v832_v53 = vmul.f32 %v2415_v0, %v3443_v59  ;;  %v812_v34 = vrot.slane %v811_v26, 4  ;;  %v833_v56 = vmul.f32 %v2419_v30, %v3411_v32  ;;  %v2625_v36 = vmul.f32 %v2423_v40, %v3443_v59 }
 0x106   :  { %3441 = vst [vmem:[#allocation92_spill] sm:$0xff] %v2609_v1  ;;  %3442 = vst [vmem:[#allocation93_spill] sm:$0xff] %v2613_v45  ;;  %v2629_v37 = vmul.f32 %v2427_v7, %v3411_v32  ;;  %v819_v3 = vrot.slane %v818_v16, 4  ;;  %v826_v2 = vrot.slane %v825_v18, 4  ;;  %v3446_v45 = vld [vmem:[#allocation73_spill] sm:$0xff] }
 0x107   :  { %v834_v13 = vmul.f32 %v2415_v0, %v832_v53  ;;  %v836_v38 = vmul.f32 %v2423_v40, %v832_v53  ;;  %v813_v21 = vadd.f32 %v812_v34, %v811_v26  ;;  %v835_v15 = vmul.f32 %v2419_v30, %v833_v56 }
 0x108   :  { %v837_v10 = vmul.f32 %v2427_v7, %v833_v56  ;;  %v838_v62 = vmul.f32 %v2431_v46, %v832_v53  ;;  %v820_v57 = vadd.f32 %v819_v3, %v818_v16  ;;  %v827_v5 = vadd.f32 %v826_v2, %v825_v18  ;;  %v3444_v18 = vld [vmem:[#allocation71_spill] sm:$0xff]  ;;  %v3445_v3 = vld [vmem:[#allocation72_spill] sm:$0xff] }
 0x109   :  { %v839_v43 = vmul.f32 %v2435_v60, %v833_v56  ;;  %v840_v12 = vmul.f32 %v2439_v17, %v832_v53  ;;  %v814_v47 = vrot.slane %v813_v21, 2  ;;  %v841_v19 = vmul.f32 %v2443_v48, %v833_v56 }
 0x10a   :  { %v842_v0 = vmul.f32 %v2449_v51, %v832_v53  ;;  %v843_v4 = vmul.f32 %v2453_v58, %v833_v56  ;;  %v821_v20 = vrot.slane %v820_v57, 2  ;;  %v828_v61 = vrot.slane %v827_v5, 2 }
 0x10b   :  { %v844_v30 = vmul.f32 %v2457_v39, %v832_v53  ;;  %v845_v42 = vmul.f32 %v2469_v44, %v833_v56  ;;  %v815_v9 = vadd.f32 %v814_v47, %v813_v21  ;;  %v846_v8 = vmul.f32 %v2473_v41, %v832_v53 }
 0x10c   :  { %v847_v63 = vmul.f32 %v2479_v6, %v833_v56  ;;  %v848_v52 = vmul.f32 %v2485_v35, %v832_v53  ;;  %v822_v22 = vadd.f32 %v821_v20, %v820_v57  ;;  %v829_v55 = vadd.f32 %v828_v61, %v827_v5 }
 0x10d   :  { %v849_v50 = vmul.f32 %v2491_v11, %v833_v56  ;;  %v2648_v26 = vmul.f32 %v2497_v28, %v832_v53  ;;  %v816_v16 = vrot.slane %v815_v9, 1  ;;  %v851_v34 = vmul.f32 %v3444_v18, %v833_v56 }
 0x10e   :  { %v852_v2 = vmul.f32 %v3445_v3, %v832_v53  ;;  %v853_v21 = vmul.f32 %v3446_v45, %v833_v56  ;;  %v823_v47 = vrot.slane %v822_v22, 1  ;;  %v830_v1 = vrot.slane %v829_v55, 1 }
 0x10f   :  { %v854_v24 = vadd.f32 %v835_v15, %v834_v13  ;;  %v861_v49 = vadd.f32 %v837_v10, %v836_v38  ;;  %v2653_v33 = vadd.f32 %v816_v16, %v815_v9  ;;  %v868_v57 = vadd.f32 %v839_v43, %v838_v62 }
 0x110   :  { %v875_v5 = vadd.f32 %v841_v19, %v840_v12  ;;  %v882_v20 = vadd.f32 %v843_v4, %v842_v0  ;;  %v2655_v61 = vadd.f32 %v823_v47, %v822_v22  ;;  %v2657_v29 = vadd.f32 %v830_v1, %v829_v55 }
 0x111   :  { %v855_v23 = vrot.slane %v854_v24, 4  ;;  %v862_v54 = vrot.slane %v861_v49, 4  ;;  %v869_v14 = vrot.slane %v868_v57, 4  ;;  %v889_v25 = vadd.f32 %v845_v42, %v844_v30 }
 0x112   :  { %3447 = vst [vmem:[#allocation11_spill] sm:$0xff] %v2655_v61  ;;  %3448 = vst [vmem:[#allocation71_spill] sm:$0xff] %v2657_v29  ;;  %v876_v27 = vrot.slane %v875_v5, 4  ;;  %v883_v53 = vrot.slane %v882_v20, 4  ;;  %v896_v32 = vadd.f32 %v847_v63, %v846_v8  ;;  %v903_v13 = vadd.f32 %v849_v50, %v848_v52 }
 0x113   :  { %v856_v56 = vadd.f32 %v855_v23, %v854_v24  ;;  %v863_v31 = vadd.f32 %v862_v54, %v861_v49  ;;  %v870_v38 = vadd.f32 %v869_v14, %v868_v57  ;;  %v890_v62 = vrot.slane %v889_v25, 4 }
 0x114   :  { %v877_v15 = vadd.f32 %v876_v27, %v875_v5  ;;  %v884_v10 = vadd.f32 %v883_v53, %v882_v20  ;;  %v897_v19 = vrot.slane %v896_v32, 4  ;;  %v904_v0 = vrot.slane %v903_v13, 4 }
 0x115   :  { %v857_v43 = vrot.slane %v856_v56, 2  ;;  %v864_v12 = vrot.slane %v863_v31, 2  ;;  %v871_v1 = vrot.slane %v870_v38, 2  ;;  %v891_v22 = vadd.f32 %v890_v62, %v889_v25 }
 0x116   :  { %v878_v4 = vrot.slane %v877_v15, 2  ;;  %v885_v9 = vrot.slane %v884_v10, 2  ;;  %v898_v47 = vadd.f32 %v897_v19, %v896_v32  ;;  %v905_v30 = vadd.f32 %v904_v0, %v903_v13 }
 0x117   :  { %v858_v55 = vadd.f32 %v857_v43, %v856_v56  ;;  %v865_v16 = vadd.f32 %v864_v12, %v863_v31  ;;  %v872_v24 = vadd.f32 %v871_v1, %v870_v38  ;;  %v892_v49 = vrot.slane %v891_v22, 2 }
 0x118   :  { %v879_v23 = vadd.f32 %v878_v4, %v877_v15  ;;  %v886_v54 = vadd.f32 %v885_v9, %v884_v10  ;;  %v899_v42 = vrot.slane %v898_v47, 2  ;;  %v906_v8 = vrot.slane %v905_v30, 2 }
 0x119   :  { %v859_v14 = vrot.slane %v858_v55, 1  ;;  %v866_v27 = vrot.slane %v865_v16, 1  ;;  %v873_v63 = vrot.slane %v872_v24, 1  ;;  %v893_v57 = vadd.f32 %v892_v49, %v891_v22 }
 0x11a   :  { %v880_v52 = vrot.slane %v879_v23, 1  ;;  %v887_v50 = vrot.slane %v886_v54, 1  ;;  %v900_v25 = vadd.f32 %v899_v42, %v898_v47  ;;  %v907_v31 = vadd.f32 %v906_v8, %v905_v30 }
 0x11b   :  { %v2659_v5 = vadd.f32 %v859_v14, %v858_v55  ;;  %v2661_v20 = vadd.f32 %v866_v27, %v865_v16  ;;  %v2663_v32 = vadd.f32 %v873_v63, %v872_v24  ;;  %v894_v13 = vrot.slane %v893_v57, 1 }
 0x11c   :  { %v2665_v53 = vadd.f32 %v880_v52, %v879_v23  ;;  %v2667_v56 = vadd.f32 %v887_v50, %v886_v54  ;;  %v901_v38 = vrot.slane %v900_v25, 1  ;;  %v908_v15 = vrot.slane %v907_v31, 1 }
 0x11d   :  { %v910_v10 = vadd.f32 %v851_v34, %v2648_v26  ;;  %v917_v62 = vadd.f32 %v853_v21, %v852_v2  ;;  %v2670_v43 = vadd.f32 %v894_v13, %v893_v57  ;;  %v926_v12 = vmul.f32 %v2423_v40, %v2625_v36 }
 0x11e   :  { %3449 = vst [vmem:[#allocation72_spill] sm:$0xff] %v2665_v53  ;;  %3450 = vst [vmem:[#allocation73_spill] sm:$0xff] %v2667_v56  ;;  %v927_v19 = vmul.f32 %v2427_v7, %v2629_v37  ;;  %v928_v0 = vmul.f32 %v2431_v46, %v2625_v36  ;;  %v2678_v1 = vadd.f32 %v901_v38, %v900_v25 }
 0x11f   :  { %3451 = vst [vmem:[#allocation94_spill] sm:$0xff] %v2670_v43  ;;  %v2680_v4 = vadd.f32 %v908_v15, %v907_v31  ;;  %v911_v9 = vrot.slane %v910_v10, 4  ;;  %v918_v22 = vrot.slane %v917_v62, 4  ;;  %v929_v26 = vmul.f32 %v2435_v60, %v2629_v37 }
 0x120   :  { %3452 = vst [vmem:[#allocation95_spill] sm:$0xff] %v2678_v1  ;;  %v930_v34 = vmul.f32 %v2439_v17, %v2625_v36  ;;  %v931_v40 = vmul.f32 %v2443_v48, %v2629_v37  ;;  %v932_v7 = vmul.f32 %v2449_v51, %v2625_v36  ;;  %v933_v55 = vmul.f32 %v2453_v58, %v2629_v37 }
 0x121   :  { %v912_v2 = vadd.f32 %v911_v9, %v910_v10  ;;  %v919_v21 = vadd.f32 %v918_v22, %v917_v62  ;;  %v934_v16 = vmul.f32 %v2457_v39, %v2625_v36  ;;  %v935_v47 = vmul.f32 %v2469_v44, %v2629_v37 }
 0x122   :  { %v936_v30 = vmul.f32 %v2473_v41, %v2625_v36  ;;  %v937_v24 = vmul.f32 %v2479_v6, %v2629_v37  ;;  %v938_v23 = vmul.f32 %v2485_v35, %v2625_v36  ;;  %v939_v14 = vmul.f32 %v2491_v11, %v2629_v37 }
 0x123   :  { %v913_v54 = vrot.slane %v912_v2, 2  ;;  %v920_v49 = vrot.slane %v919_v21, 2  ;;  %v940_v27 = vmul.f32 %v2497_v28, %v2625_v36  ;;  %v941_v42 = vmul.f32 %v3444_v18, %v2629_v37 }
 0x124   :  { %v942_v8 = vmul.f32 %v3445_v3, %v2625_v36  ;;  %v943_v63 = vmul.f32 %v3446_v45, %v2629_v37  ;;  %v944_v52 = vadd.f32 %v927_v19, %v926_v12  ;;  %v951_v25 = vadd.f32 %v929_v26, %v928_v0 }
 0x125   :  { %v914_v50 = vadd.f32 %v913_v54, %v912_v2  ;;  %v921_v57 = vadd.f32 %v920_v49, %v919_v21  ;;  %v958_v31 = vadd.f32 %v931_v40, %v930_v34  ;;  %v965_v38 = vadd.f32 %v933_v55, %v932_v7 }
 0x126   :  { %v945_v13 = vrot.slane %v944_v52, 4  ;;  %v972_v15 = vadd.f32 %v935_v47, %v934_v16  ;;  %v979_v10 = vadd.f32 %v937_v24, %v936_v30  ;;  %v952_v22 = vrot.slane %v951_v25, 4 }
 0x127   :  { %v915_v62 = vrot.slane %v914_v50, 1  ;;  %v922_v9 = vrot.slane %v921_v57, 1  ;;  %v959_v29 = vrot.slane %v958_v31, 4  ;;  %v966_v43 = vrot.slane %v965_v38, 4 }
 0x128   :  { %v946_v1 = vadd.f32 %v945_v13, %v944_v52  ;;  %v973_v56 = vrot.slane %v972_v15, 4  ;;  %v980_v36 = vrot.slane %v979_v10, 4  ;;  %v953_v12 = vadd.f32 %v952_v22, %v951_v25 }
 0x129   :  { %v2712_v61 = vadd.f32 %v915_v62, %v914_v50  ;;  %v2714_v37 = vadd.f32 %v922_v9, %v921_v57  ;;  %v960_v19 = vadd.f32 %v959_v29, %v958_v31  ;;  %v967_v26 = vadd.f32 %v966_v43, %v965_v38 }
 0x12a   :  { %v947_v0 = vrot.slane %v946_v1, 2  ;;  %v974_v34 = vadd.f32 %v973_v56, %v972_v15  ;;  %v981_v40 = vadd.f32 %v980_v36, %v979_v10  ;;  %v954_v7 = vrot.slane %v953_v12, 2 }
 0x12b   :  { %v961_v2 = vrot.slane %v960_v19, 2  ;;  %v986_v21 = vadd.f32 %v939_v14, %v938_v23  ;;  %v993_v55 = vadd.f32 %v941_v42, %v940_v27  ;;  %v968_v47 = vrot.slane %v967_v26, 2 }
 0x12c   :  { %v948_v16 = vadd.f32 %v947_v0, %v946_v1  ;;  %v975_v30 = vrot.slane %v974_v34, 2  ;;  %v982_v24 = vrot.slane %v981_v40, 2  ;;  %v955_v54 = vadd.f32 %v954_v7, %v953_v12 }
 0x12d   :  { %v962_v49 = vadd.f32 %v961_v2, %v960_v19  ;;  %v987_v52 = vrot.slane %v986_v21, 4  ;;  %v994_v50 = vrot.slane %v993_v55, 4  ;;  %v969_v13 = vadd.f32 %v968_v47, %v967_v26 }
 0x12e   :  { %v949_v57 = vrot.slane %v948_v16, 1  ;;  %v976_v25 = vadd.f32 %v975_v30, %v974_v34  ;;  %v983_v29 = vadd.f32 %v982_v24, %v981_v40  ;;  %v956_v31 = vrot.slane %v955_v54, 1  ;;  %v3457_v34 = vld [vmem:[#allocation12_spill] sm:$0xff] }
 0x12f   :  { %v963_v43 = vrot.slane %v962_v49, 1  ;;  %v988_v56 = vadd.f32 %v987_v52, %v986_v21  ;;  %v995_v38 = vadd.f32 %v994_v50, %v993_v55  ;;  %v970_v23 = vrot.slane %v969_v13, 1 }
 0x130   :  { %v2716_v15 = vadd.f32 %v949_v57, %v948_v16  ;;  %v977_v14 = vrot.slane %v976_v25, 1  ;;  %v984_v1 = vrot.slane %v983_v29, 1  ;;  %v2718_v27 = vadd.f32 %v956_v31, %v955_v54 }
 0x131   :  { %v2720_v42 = vadd.f32 %v963_v43, %v962_v49  ;;  %v989_v10 = vrot.slane %v988_v56, 2  ;;  %v996_v62 = vrot.slane %v995_v38, 2  ;;  %v2722_v9 = vadd.f32 %v970_v23, %v969_v13 }
 0x132   :  { %v2724_v22 = vadd.f32 %v977_v14, %v976_v25  ;;  %v2726_v36 = vadd.f32 %v984_v1, %v983_v29  ;;  %v1000_v12 = vadd.f32 %v943_v63, %v942_v8  ;;  %v1007_v26 = vmul.f32 %v2431_v46, %v3443_v59 }
 0x133   :  { %3453 = vst [vmem:[#allocation96_spill] sm:$0xff] %v2720_v42  ;;  %3454 = vst [vmem:[#allocation97_spill] sm:$0xff] %v2722_v9  ;;  %v990_v19 = vadd.f32 %v989_v10, %v988_v56  ;;  %v997_v0 = vadd.f32 %v996_v62, %v995_v38  ;;  %v1008_v40 = vmul.f32 %v2435_v60, %v3457_v34 }
 0x134   :  { %3455 = vst [vmem:[#allocation98_spill] sm:$0xff] %v2724_v22  ;;  %3456 = vst [vmem:[#allocation99_spill] sm:$0xff] %v2726_v36  ;;  %v1001_v7 = vrot.slane %v1000_v12, 4  ;;  %v2734_v2 = vmul.f32 %v2439_v17, %v3443_v59  ;;  %v2738_v21 = vmul.f32 %v2443_v48, %v3457_v34  ;;  %v2742_v8 = vmul.f32 %v2449_v51, %v3443_v59 }
 0x135   :  { %v991_v63 = vrot.slane %v990_v19, 1  ;;  %v998_v55 = vrot.slane %v997_v0, 1  ;;  %v1009_v16 = vmul.f32 %v2431_v46, %v1007_v26  ;;  %v1010_v47 = vmul.f32 %v2435_v60, %v1008_v40 }
 0x136   :  { %v1002_v30 = vadd.f32 %v1001_v7, %v1000_v12  ;;  %v1011_v24 = vmul.f32 %v2439_v17, %v1007_v26  ;;  %v1012_v54 = vmul.f32 %v2443_v48, %v1008_v40  ;;  %v1013_v49 = vmul.f32 %v2449_v51, %v1007_v26 }
 0x137   :  { %v2749_v52 = vadd.f32 %v991_v63, %v990_v19  ;;  %v2751_v50 = vadd.f32 %v998_v55, %v997_v0  ;;  %v1014_v57 = vmul.f32 %v2453_v58, %v1008_v40  ;;  %v1015_v13 = vmul.f32 %v2457_v39, %v1007_v26 }
 0x138   :  { %v1003_v25 = vrot.slane %v1002_v30, 2  ;;  %v1016_v46 = vmul.f32 %v2469_v44, %v1008_v40  ;;  %v1017_v60 = vmul.f32 %v2473_v41, %v1007_v26  ;;  %v1018_v29 = vmul.f32 %v2479_v6, %v1008_v40 }
 0x139   :  { %3458 = vst [vmem:[#allocation12_spill] sm:$0xff] %v2749_v52  ;;  %3459 = vst [vmem:[#allocation100_spill] sm:$0xff] %v2751_v50  ;;  %v1019_v31 = vmul.f32 %v2485_v35, %v1007_v26  ;;  %v1020_v43 = vmul.f32 %v2491_v11, %v1008_v40  ;;  %v1021_v56 = vmul.f32 %v2497_v28, %v1007_v26 }
 0x13a   :  { %v1022_v38 = vmul.f32 %v3444_v18, %v1008_v40  ;;  %v1004_v23 = vadd.f32 %v1003_v25, %v1002_v30  ;;  %v1023_v14 = vmul.f32 %v3445_v3, %v1007_v26  ;;  %v1024_v1 = vmul.f32 %v3446_v45, %v1008_v40 }
 0x13b   :  { %v1025_v10 = vadd.f32 %v1010_v47, %v1009_v16  ;;  %v1032_v62 = vadd.f32 %v1012_v54, %v1011_v24  ;;  %v1039_v12 = vadd.f32 %v1014_v57, %v1013_v49  ;;  %v1046_v19 = vadd.f32 %v1016_v46, %v1015_v13 }
 0x13c   :  { %v1053_v0 = vadd.f32 %v1018_v29, %v1017_v60  ;;  %v1005_v7 = vrot.slane %v1004_v23, 1  ;;  %v1060_v55 = vadd.f32 %v1020_v43, %v1019_v31  ;;  %v1067_v22 = vadd.f32 %v1022_v38, %v1021_v56 }
 0x13d   :  { %v1026_v63 = vrot.slane %v1025_v10, 4  ;;  %v1033_v50 = vrot.slane %v1032_v62, 4  ;;  %v1040_v9 = vrot.slane %v1039_v12, 4  ;;  %v1047_v52 = vrot.slane %v1046_v19, 4 }
 0x13e   :  { %v1054_v36 = vrot.slane %v1053_v0, 4  ;;  %v2764_v42 = vadd.f32 %v1005_v7, %v1004_v23  ;;  %v1061_v25 = vrot.slane %v1060_v55, 4  ;;  %v1068_v26 = vrot.slane %v1067_v22, 4 }
 0x13f   :  { %v1027_v30 = vadd.f32 %v1026_v63, %v1025_v10  ;;  %v1034_v53 = vadd.f32 %v1033_v50, %v1032_v62  ;;  %v1041_v40 = vadd.f32 %v1040_v9, %v1039_v12  ;;  %v1048_v16 = vadd.f32 %v1047_v52, %v1046_v19 }
 0x140   :  { %v1055_v47 = vadd.f32 %v1054_v36, %v1053_v0  ;;  %v1062_v54 = vadd.f32 %v1061_v25, %v1060_v55  ;;  %v1069_v49 = vadd.f32 %v1068_v26, %v1067_v22  ;;  %v1074_v57 = vadd.f32 %v1024_v1, %v1023_v14 }
 0x141   :  { %v1028_v24 = vrot.slane %v1027_v30, 2  ;;  %v1035_v13 = vrot.slane %v1034_v53, 2  ;;  %v1042_v46 = vrot.slane %v1041_v40, 2  ;;  %v1049_v60 = vrot.slane %v1048_v16, 2 }
 0x142   :  { %v1056_v29 = vrot.slane %v1055_v47, 2  ;;  %v1063_v43 = vrot.slane %v1062_v54, 2  ;;  %v1070_v56 = vrot.slane %v1069_v49, 2  ;;  %v1075_v38 = vrot.slane %v1074_v57, 4 }
 0x143   :  { %v1029_v31 = vadd.f32 %v1028_v24, %v1027_v30  ;;  %v1036_v23 = vadd.f32 %v1035_v13, %v1034_v53  ;;  %v1043_v10 = vadd.f32 %v1042_v46, %v1041_v40  ;;  %v1050_v7 = vadd.f32 %v1049_v60, %v1048_v16 }
 0x144   :  { %v1057_v63 = vadd.f32 %v1056_v29, %v1055_v47  ;;  %v1064_v9 = vadd.f32 %v1063_v43, %v1062_v54  ;;  %v1071_v52 = vadd.f32 %v1070_v56, %v1069_v49  ;;  %v1076_v36 = vadd.f32 %v1075_v38, %v1074_v57 }
 0x145   :  { %v1030_v50 = vrot.slane %v1029_v31, 1  ;;  %v1037_v62 = vrot.slane %v1036_v23, 1  ;;  %v1044_v12 = vrot.slane %v1043_v10, 1  ;;  %v1051_v22 = vrot.slane %v1050_v7, 1 }
 0x146   :  { %v1058_v14 = vrot.slane %v1057_v63, 1  ;;  %v1065_v19 = vrot.slane %v1064_v9, 1  ;;  %v1072_v0 = vrot.slane %v1071_v52, 1  ;;  %v1077_v55 = vrot.slane %v1076_v36, 2 }
 0x147   :  { %v2766_v1 = vadd.f32 %v1030_v50, %v1029_v31  ;;  %v2768_v30 = vadd.f32 %v1037_v62, %v1036_v23  ;;  %v2770_v25 = vadd.f32 %v1044_v12, %v1043_v10  ;;  %v2772_v53 = vadd.f32 %v1051_v22, %v1050_v7 }
 0x148   :  { %v2774_v26 = vadd.f32 %v1058_v14, %v1057_v63  ;;  %v2776_v40 = vadd.f32 %v1065_v19, %v1064_v9  ;;  %v2778_v16 = vadd.f32 %v1072_v0, %v1071_v52  ;;  %v1078_v47 = vadd.f32 %v1077_v55, %v1076_v36 }
 0x149   :  { %v1083_v24 = vmul.f32 %v2439_v17, %v2734_v2  ;;  %v1084_v54 = vmul.f32 %v2443_v48, %v2738_v21  ;;  %v1085_v49 = vmul.f32 %v2449_v51, %v2734_v2  ;;  %v1086_v57 = vmul.f32 %v2453_v58, %v2738_v21 }
 0x14a   :  { %v1087_v13 = vmul.f32 %v2457_v39, %v2734_v2  ;;  %v1079_v46 = vrot.slane %v1078_v47, 1  ;;  %v1088_v60 = vmul.f32 %v2469_v44, %v2738_v21  ;;  %v1089_v29 = vmul.f32 %v2473_v41, %v2734_v2 }
 0x14b   :  { %v1090_v17 = vmul.f32 %v2479_v6, %v2738_v21  ;;  %v1091_v48 = vmul.f32 %v2485_v35, %v2734_v2  ;;  %v1092_v31 = vmul.f32 %v2491_v11, %v2738_v21  ;;  %v1093_v43 = vmul.f32 %v2497_v28, %v2734_v2 }
 0x14c   :  { %v1094_v56 = vmul.f32 %v3444_v18, %v2738_v21  ;;  %v2804_v38 = vadd.f32 %v1079_v46, %v1078_v47  ;;  %v1095_v23 = vmul.f32 %v3445_v3, %v2734_v2  ;;  %v1096_v6 = vmul.f32 %v3446_v45, %v2738_v21 }
 0x14d   :  { %v1097_v10 = vadd.f32 %v1084_v54, %v1083_v24  ;;  %v1104_v7 = vadd.f32 %v1086_v57, %v1085_v49  ;;  %v1111_v35 = vadd.f32 %v1088_v60, %v1087_v13  ;;  %v1118_v63 = vadd.f32 %v1090_v17, %v1089_v29 }
 0x14e   :  { %3460 = vst [vmem:[#allocation101_spill] sm:$0xff] %v2804_v38  ;;  %v1125_v50 = vadd.f32 %v1092_v31, %v1091_v48  ;;  %v1132_v9 = vadd.f32 %v1094_v56, %v1093_v43  ;;  %v1139_v52 = vadd.f32 %v1096_v6, %v1095_v23  ;;  %v1147_v28 = vmul.f32 %v2453_v58, %v3457_v34 }
 0x14f   :  { %v1098_v11 = vrot.slane %v1097_v10, 4  ;;  %v1105_v18 = vrot.slane %v1104_v7, 4  ;;  %v1112_v36 = vrot.slane %v1111_v35, 4  ;;  %v1119_v62 = vrot.slane %v1118_v63, 4 }
 0x150   :  { %v1126_v12 = vrot.slane %v1125_v50, 4  ;;  %v1133_v3 = vrot.slane %v1132_v9, 4  ;;  %v1140_v2 = vrot.slane %v1139_v52, 4  ;;  %v1148_v45 = vmul.f32 %v2449_v51, %v2742_v8 }
 0x151   :  { %v1099_v22 = vadd.f32 %v1098_v11, %v1097_v10  ;;  %v1106_v21 = vadd.f32 %v1105_v18, %v1104_v7  ;;  %v1113_v14 = vadd.f32 %v1112_v36, %v1111_v35  ;;  %v1120_v19 = vadd.f32 %v1119_v62, %v1118_v63 }
 0x152   :  { %v1127_v0 = vadd.f32 %v1126_v12, %v1125_v50  ;;  %v1134_v47 = vadd.f32 %v1133_v3, %v1132_v9  ;;  %v1141_v24 = vadd.f32 %v1140_v2, %v1139_v52  ;;  %v1149_v54 = vmul.f32 %v2453_v58, %v1147_v28  ;;  %v2834_v3 = vld [vmem:[#allocation2 + $0xc8] sm:$0xff] }
 0x153   :  { %v1100_v55 = vrot.slane %v1099_v22, 2  ;;  %v1107_v49 = vrot.slane %v1106_v21, 2  ;;  %v1114_v57 = vrot.slane %v1113_v14, 2  ;;  %v1121_v13 = vrot.slane %v1120_v19, 2 }
 0x154   :  { %v1128_v46 = vrot.slane %v1127_v0, 2  ;;  %v1135_v29 = vrot.slane %v1134_v47, 2  ;;  %v1142_v17 = vrot.slane %v1141_v24, 2  ;;  %v1150_v48 = vmul.f32 %v2457_v39, %v2742_v8 }
 0x155   :  { %v1101_v60 = vadd.f32 %v1100_v55, %v1099_v22  ;;  %v1108_v51 = vadd.f32 %v1107_v49, %v1106_v21  ;;  %v1115_v31 = vadd.f32 %v1114_v57, %v1113_v14  ;;  %v1122_v43 = vadd.f32 %v1121_v13, %v1120_v19  ;;  %v2837_v21 = vld [vmem:[#allocation2 + $0xd0] sm:$0xff]  ;;  %v2841_v14 = vld [vmem:[#allocation2 + $0xd8] sm:$0xff] }
 0x156   :  { %v1129_v56 = vadd.f32 %v1128_v46, %v1127_v0  ;;  %v1136_v6 = vadd.f32 %v1135_v29, %v1134_v47  ;;  %v1143_v10 = vadd.f32 %v1142_v17, %v1141_v24  ;;  %v1151_v7 = vmul.f32 %v2469_v44, %v1147_v28  ;;  %v2844_v0 = vld [vmem:[#allocation2 + $0xe0] sm:$0xff]  ;;  %v2848_v47 = vld [vmem:[#allocation2 + $0xe8] sm:$0xff]  ;;  %v2851_v49 = vld [vmem:[#allocation2 + $0xf0] sm:$0xff] }
 0x157   :  { %v1102_v23 = vrot.slane %v1101_v60, 1  ;;  %v1109_v58 = vrot.slane %v1108_v51, 1  ;;  %v1116_v35 = vrot.slane %v1115_v31, 1  ;;  %v1123_v63 = vrot.slane %v1122_v43, 1  ;;  %v2855_v13 = vld [vmem:[#allocation2 + $0xf8] sm:$0xff] }
 0x158   :  { %v1130_v50 = vrot.slane %v1129_v56, 1  ;;  %v1137_v9 = vrot.slane %v1136_v6, 1  ;;  %v1144_v52 = vrot.slane %v1143_v10, 1  ;;  %v1152_v39 = vmul.f32 %v2473_v41, %v2742_v8 }
 0x159   :  { %v2818_v11 = vadd.f32 %v1102_v23, %v1101_v60  ;;  %v2822_v18 = vadd.f32 %v1109_v58, %v1108_v51  ;;  %v2824_v36 = vadd.f32 %v1116_v35, %v1115_v31  ;;  %v2826_v62 = vadd.f32 %v1123_v63, %v1122_v43  ;;  %v1720_v43 = vld [vmem:[#allocation2 + $0xb0] sm:$0xff]  ;;  %v1721_v23 = vld [vmem:[#allocation2 + $0xb8] sm:$0xff] }
 0x15a   :  { %v2828_v12 = vadd.f32 %v1130_v50, %v1129_v56  ;;  %v2830_v44 = vadd.f32 %v1137_v9, %v1136_v6  ;;  %v2832_v22 = vadd.f32 %v1144_v52, %v1143_v10  ;;  %v1153_v2 = vmul.f32 %v2834_v3, %v1147_v28 }
 0x15b   :  { %3461 = vst [vmem:[#allocation102_spill] sm:$0xff] %v2824_v36  ;;  %3462 = vst [vmem:[#allocation103_spill] sm:$0xff] %v2826_v62  ;;  %v1154_v41 = vmul.f32 %v2837_v21, %v2742_v8  ;;  %v1155_v19 = vmul.f32 %v2841_v14, %v1147_v28  ;;  %v1156_v55 = vmul.f32 %v2844_v0, %v2742_v8 }
 0x15c   :  { %3463 = vst [vmem:[#allocation104_spill] sm:$0xff] %v2828_v12  ;;  %3464 = vst [vmem:[#allocation105_spill] sm:$0xff] %v2830_v44  ;;  %v1157_v24 = vmul.f32 %v2848_v47, %v1147_v28  ;;  %v1158_v57 = vmul.f32 %v2851_v49, %v2742_v8  ;;  %v1159_v46 = vmul.f32 %v2855_v13, %v1147_v28 }
 0x15d   :  { %3465 = vst [vmem:[#allocation106_spill] sm:$0xff] %v2832_v22  ;;  %v1160_v60 = vadd.f32 %v1149_v54, %v1148_v45  ;;  %v1167_v29 = vadd.f32 %v1151_v7, %v1150_v48  ;;  %v1174_v17 = vadd.f32 %v1153_v2, %v1152_v39  ;;  %v1181_v51 = vadd.f32 %v1155_v19, %v1154_v41  ;;  %v1722_v2 = vld [vmem:[#allocation2 + $0xc0] sm:$0xff] }
 0x15e   :  { %v1188_v31 = vadd.f32 %v1157_v24, %v1156_v55  ;;  %v1202_v56 = vmul.f32 %v1720_v43, %v3443_v59  ;;  %v1203_v6 = vmul.f32 %v1721_v23, %v3457_v34  ;;  %v1195_v63 = vadd.f32 %v1159_v46, %v1158_v57 }
 0x15f   :  { %v1161_v10 = vrot.slane %v1160_v60, 4  ;;  %v1168_v58 = vrot.slane %v1167_v29, 4  ;;  %v1175_v35 = vrot.slane %v1174_v17, 4  ;;  %v1182_v8 = vrot.slane %v1181_v51, 4 }
 0x160   :  { %v1189_v50 = vrot.slane %v1188_v31, 4  ;;  %v1204_v9 = vmul.f32 %v1720_v43, %v1202_v56  ;;  %v1205_v52 = vmul.f32 %v1721_v23, %v1203_v6  ;;  %v1196_v48 = vrot.slane %v1195_v63, 4 }
 0x161   :  { %v1162_v28 = vadd.f32 %v1161_v10, %v1160_v60  ;;  %v1169_v45 = vadd.f32 %v1168_v58, %v1167_v29  ;;  %v1176_v54 = vadd.f32 %v1175_v35, %v1174_v17  ;;  %v1183_v7 = vadd.f32 %v1182_v8, %v1181_v51 }
 0x162   :  { %v1190_v39 = vadd.f32 %v1189_v50, %v1188_v31  ;;  %v1206_v41 = vmul.f32 %v1722_v2, %v1202_v56  ;;  %v1207_v19 = vmul.f32 %v2834_v3, %v1203_v6  ;;  %v1197_v62 = vadd.f32 %v1196_v48, %v1195_v63 }
 0x163   :  { %v1163_v55 = vrot.slane %v1162_v28, 2  ;;  %v1170_v24 = vrot.slane %v1169_v45, 2  ;;  %v1177_v22 = vrot.slane %v1176_v54, 2  ;;  %v1184_v38 = vrot.slane %v1183_v7, 2 }
 0x164   :  { %v1191_v57 = vrot.slane %v1190_v39, 2  ;;  %v1208_v46 = vmul.f32 %v2837_v21, %v1202_v56  ;;  %v1209_v43 = vmul.f32 %v2841_v14, %v1203_v6  ;;  %v1198_v23 = vrot.slane %v1197_v62, 2 }
 0x165   :  { %v1164_v60 = vadd.f32 %v1163_v55, %v1162_v28  ;;  %v1171_v29 = vadd.f32 %v1170_v24, %v1169_v45  ;;  %v1178_v17 = vadd.f32 %v1177_v22, %v1176_v54  ;;  %v1185_v51 = vadd.f32 %v1184_v38, %v1183_v7 }
 0x166   :  { %v1192_v31 = vadd.f32 %v1191_v57, %v1190_v39  ;;  %v1210_v10 = vmul.f32 %v2844_v0, %v1202_v56  ;;  %v1211_v58 = vmul.f32 %v2848_v47, %v1203_v6  ;;  %v1199_v63 = vadd.f32 %v1198_v23, %v1197_v62 }
 0x167   :  { %v1165_v35 = vrot.slane %v1164_v60, 1  ;;  %v1172_v8 = vrot.slane %v1171_v29, 1  ;;  %v1179_v50 = vrot.slane %v1178_v17, 1  ;;  %v1186_v48 = vrot.slane %v1185_v51, 1 }
 0x168   :  { %v1193_v44 = vrot.slane %v1192_v31, 1  ;;  %v1212_v12 = vmul.f32 %v2851_v49, %v1202_v56  ;;  %v1213_v36 = vmul.f32 %v2855_v13, %v1203_v6  ;;  %v1200_v45 = vrot.slane %v1199_v63, 1 }
 0x169   :  { %v2867_v28 = vadd.f32 %v1165_v35, %v1164_v60  ;;  %v2869_v22 = vadd.f32 %v1172_v8, %v1171_v29  ;;  %v2871_v38 = vadd.f32 %v1179_v50, %v1178_v17  ;;  %v2873_v54 = vadd.f32 %v1186_v48, %v1185_v51 }
 0x16a   :  { %v2875_v7 = vadd.f32 %v1193_v44, %v1192_v31  ;;  %v1214_v39 = vadd.f32 %v1205_v52, %v1204_v9  ;;  %v1221_v55 = vadd.f32 %v1207_v19, %v1206_v41  ;;  %v2877_v62 = vadd.f32 %v1200_v45, %v1199_v63 }
 0x16b   :  { %3466 = vst [vmem:[#allocation107_spill] sm:$0xff] %v2869_v22  ;;  %3467 = vst [vmem:[#allocation108_spill] sm:$0xff] %v2871_v38  ;;  %v1228_v24 = vadd.f32 %v1209_v43, %v1208_v46  ;;  %v1235_v57 = vadd.f32 %v1211_v58, %v1210_v10  ;;  %v1242_v56 = vadd.f32 %v1213_v36, %v1212_v12 }
 0x16c   :  { %3468 = vst [vmem:[#allocation109_spill] sm:$0xff] %v2873_v54  ;;  %3469 = vst [vmem:[#allocation110_spill] sm:$0xff] %v2875_v7  ;;  %v1215_v23 = vrot.slane %v1214_v39, 4  ;;  %v1222_v6 = vrot.slane %v1221_v55, 4  ;;  %v1249_v60 = vmul.f32 %v1722_v2, %v3443_v59  ;;  %v1250_v29 = vmul.f32 %v2834_v3, %v3457_v34 }
 0x16d   :  { %3470 = vst [vmem:[#allocation111_spill] sm:$0xff] %v2877_v62  ;;  %v1229_v17 = vrot.slane %v1228_v24, 4  ;;  %v1236_v35 = vrot.slane %v1235_v57, 4  ;;  %v1243_v51 = vrot.slane %v1242_v56, 4  ;;  %v1287_v44 = vmul.f32 %v2837_v21, %v3443_v59 }
 0x16e   :  { %v1216_v9 = vadd.f32 %v1215_v23, %v1214_v39  ;;  %v1223_v52 = vadd.f32 %v1222_v6, %v1221_v55  ;;  %v1251_v41 = vmul.f32 %v1722_v2, %v1249_v60  ;;  %v1252_v19 = vmul.f32 %v2834_v3, %v1250_v29 }
 0x16f   :  { %v1230_v46 = vadd.f32 %v1229_v17, %v1228_v24  ;;  %v1237_v36 = vadd.f32 %v1236_v35, %v1235_v57  ;;  %v1244_v12 = vadd.f32 %v1243_v51, %v1242_v56  ;;  %v1253_v43 = vmul.f32 %v2837_v21, %v1249_v60 }
 0x170   :  { %v1217_v31 = vrot.slane %v1216_v9, 2  ;;  %v1224_v10 = vrot.slane %v1223_v52, 2  ;;  %v1254_v58 = vmul.f32 %v2841_v14, %v1250_v29  ;;  %v1255_v8 = vmul.f32 %v2844_v0, %v1249_v60 }
 0x171   :  { %v1231_v50 = vrot.slane %v1230_v46, 2  ;;  %v1238_v63 = vrot.slane %v1237_v36, 2  ;;  %v1245_v48 = vrot.slane %v1244_v12, 2  ;;  %v1256_v45 = vmul.f32 %v2848_v47, %v1250_v29 }
 0x172   :  { %v1218_v39 = vadd.f32 %v1217_v31, %v1216_v9  ;;  %v1225_v2 = vadd.f32 %v1224_v10, %v1223_v52  ;;  %v1257_v3 = vmul.f32 %v2851_v49, %v1249_v60  ;;  %v1258_v55 = vmul.f32 %v2855_v13, %v1250_v29 }
 0x173   :  { %v1232_v24 = vadd.f32 %v1231_v50, %v1230_v46  ;;  %v1239_v57 = vadd.f32 %v1238_v63, %v1237_v36  ;;  %v1246_v56 = vadd.f32 %v1245_v48, %v1244_v12  ;;  %v1259_v23 = vadd.f32 %v1252_v19, %v1251_v41 }
 0x174   :  { %v1219_v6 = vrot.slane %v1218_v39, 1  ;;  %v1226_v17 = vrot.slane %v1225_v2, 1  ;;  %v1266_v35 = vadd.f32 %v1254_v58, %v1253_v43  ;;  %v1273_v51 = vadd.f32 %v1256_v45, %v1255_v8 }
 0x175   :  { %v1233_v62 = vrot.slane %v1232_v24, 1  ;;  %v1240_v7 = vrot.slane %v1239_v57, 1  ;;  %v1247_v54 = vrot.slane %v1246_v56, 1  ;;  %v1260_v38 = vrot.slane %v1259_v23, 4 }
 0x176   :  { %v2891_v22 = vadd.f32 %v1219_v6, %v1218_v39  ;;  %v2893_v9 = vadd.f32 %v1226_v17, %v1225_v2  ;;  %v1267_v52 = vrot.slane %v1266_v35, 4  ;;  %v1274_v60 = vrot.slane %v1273_v51, 4 }
 0x177   :  { %v2895_v31 = vadd.f32 %v1233_v62, %v1232_v24  ;;  %v2897_v29 = vadd.f32 %v1240_v7, %v1239_v57  ;;  %v2899_v46 = vadd.f32 %v1247_v54, %v1246_v56  ;;  %v1261_v41 = vadd.f32 %v1260_v38, %v1259_v23 }
 0x178   :  { %v1268_v19 = vadd.f32 %v1267_v52, %v1266_v35  ;;  %v1275_v36 = vadd.f32 %v1274_v60, %v1273_v51  ;;  %v1280_v12 = vadd.f32 %v1258_v55, %v1257_v3  ;;  %v1288_v43 = vmul.f32 %v2841_v14, %v3457_v34 }
 0x179   :  { %v1262_v10 = vrot.slane %v1261_v41, 2  ;;  %v1289_v58 = vmul.f32 %v2837_v21, %v1287_v44  ;;  %v1291_v8 = vmul.f32 %v2844_v0, %v1287_v44  ;;  %v1293_v50 = vmul.f32 %v2851_v49, %v1287_v44 }
 0x17a   :  { %v1269_v62 = vrot.slane %v1268_v19, 2  ;;  %v1276_v63 = vrot.slane %v1275_v36, 2  ;;  %v1281_v7 = vrot.slane %v1280_v12, 4  ;;  %v1290_v54 = vmul.f32 %v2841_v14, %v1288_v43 }
 0x17b   :  { %v1263_v48 = vadd.f32 %v1262_v10, %v1261_v41  ;;  %v1292_v38 = vmul.f32 %v2848_v47, %v1288_v43  ;;  %v1294_v45 = vmul.f32 %v2855_v13, %v1288_v43  ;;  %v1316_v39 = vmul.f32 %v2844_v0, %v3443_v59 }
 0x17c   :  { %v1270_v2 = vadd.f32 %v1269_v62, %v1268_v19  ;;  %v1277_v3 = vadd.f32 %v1276_v63, %v1275_v36  ;;  %v1282_v21 = vadd.f32 %v1281_v7, %v1280_v12  ;;  %v1295_v55 = vadd.f32 %v1290_v54, %v1289_v58 }
 0x17d   :  { %v1264_v24 = vrot.slane %v1263_v48, 1  ;;  %v1302_v57 = vadd.f32 %v1292_v38, %v1291_v8  ;;  %v1309_v44 = vadd.f32 %v1294_v45, %v1293_v50  ;;  %v1317_v56 = vmul.f32 %v2848_v47, %v3457_v34 }
 0x17e   :  { %v1271_v23 = vrot.slane %v1270_v2, 1  ;;  %v1278_v14 = vrot.slane %v1277_v3, 1  ;;  %v1283_v6 = vrot.slane %v1282_v21, 2  ;;  %v1296_v17 = vrot.slane %v1295_v55, 4 }
 0x17f   :  { %v2913_v35 = vadd.f32 %v1264_v24, %v1263_v48  ;;  %v1303_v51 = vrot.slane %v1302_v57, 4  ;;  %v1310_v52 = vrot.slane %v1309_v44, 4  ;;  %v1318_v60 = vmul.f32 %v2844_v0, %v1316_v39 }
 0x180   :  { %v2916_v41 = vadd.f32 %v1271_v23, %v1270_v2  ;;  %v2918_v19 = vadd.f32 %v1278_v14, %v1277_v3  ;;  %v1284_v36 = vadd.f32 %v1283_v6, %v1282_v21  ;;  %v1297_v12 = vadd.f32 %v1296_v17, %v1295_v55  ;;  %v3471_v17 = vld [vmem:[#allocation37_spill] sm:$0xff] }
 0x181   :  { %v1304_v43 = vadd.f32 %v1303_v51, %v1302_v57  ;;  %v1311_v10 = vadd.f32 %v1310_v52, %v1309_v44  ;;  %v1319_v58 = vmul.f32 %v2848_v47, %v1317_v56  ;;  %v1320_v8 = vmul.f32 %v2851_v49, %v1316_v39  ;;  %v3472_v51 = vld [vmem:[#allocation38_spill] sm:$0xff] }
 0x182   :  { %v1285_v50 = vrot.slane %v1284_v36, 1  ;;  %v1298_v62 = vrot.slane %v1297_v12, 2  ;;  %v1321_v63 = vmul.f32 %v2855_v13, %v1317_v56  ;;  %v1336_v7 = vmul.f32 %v2851_v49, %v3443_v59 }
 0x183   :  { %v1305_v0 = vrot.slane %v1304_v43, 2  ;;  %v1312_v54 = vrot.slane %v1311_v10, 2  ;;  %v1322_v48 = vadd.f32 %v1319_v58, %v1318_v60  ;;  %v1337_v38 = vmul.f32 %v2855_v13, %v3457_v34 }
 0x184   :  { %v2927_v45 = vadd.f32 %v1285_v50, %v1284_v36  ;;  %v1299_v2 = vadd.f32 %v1298_v62, %v1297_v12  ;;  %v1329_v3 = vadd.f32 %v1321_v63, %v1320_v8  ;;  %v1338_v47 = vmul.f32 %v2851_v49, %v1336_v7  ;;  %v3474_v50 = vld [vmem:[#allocation40_spill] sm:$0xff]  ;;  %v3475_v7 = vld [vmem:[#allocation41_spill] sm:$0xff] }
 0x185   :  { %v1306_v39 = vadd.f32 %v1305_v0, %v1304_v43  ;;  %v1313_v21 = vadd.f32 %v1312_v54, %v1311_v10  ;;  %v1323_v55 = vrot.slane %v1322_v48, 4  ;;  %v1339_v24 = vmul.f32 %v2855_v13, %v1337_v38  ;;  %v3473_v43 = vld [vmem:[#allocation39_spill] sm:$0xff]  ;;  %v3476_v54 = vld [vmem:[#allocation45_spill] sm:$0xff] }
 0x186   :  { %v1300_v57 = vrot.slane %v1299_v2, 1  ;;  %v1330_v44 = vrot.slane %v1329_v3, 4  ;;  %v1364_v49 = vsel %vm1363_vm0, %v3472_v51, %v3471_v17 }
 0x187   :  { %v1307_v59 = vrot.slane %v1306_v39, 1  ;;  %v1314_v56 = vrot.slane %v1313_v21, 1  ;;  %v1324_v23 = vadd.f32 %v1323_v55, %v1322_v48  ;;  %v1340_v14 = vadd.f32 %v1339_v24, %v1338_v47  ;;  %v3477_v48 = vld [vmem:[#allocation46_spill] sm:$0xff] }
 0x188   :  { %v2931_v34 = vadd.f32 %v1300_v57, %v1299_v2  ;;  %v1331_v6 = vadd.f32 %v1330_v44, %v1329_v3  ;;  %v1366_v10 = vsel %vm1365_vm1, %v3473_v43, %v1364_v49  ;;  %v1377_v38 = vsel %vm1363_vm0, %v3477_v48, %v3476_v54  ;;  %v3478_v47 = vld [vmem:[#allocation42_spill] sm:$0xff]  ;;  %v3480_v57 = vld [vmem:[#allocation43_spill] sm:$0xff]  ;;  %v3484_v49 = vld [vmem:[#allocation44_spill] sm:$0xff] }
 0x189   :  { %v2936_v52 = vadd.f32 %v1307_v59, %v1306_v39  ;;  %v2938_v60 = vadd.f32 %v1314_v56, %v1313_v21  ;;  %v1325_v13 = vrot.slane %v1324_v23, 2  ;;  %v1341_v36 = vrot.slane %v1340_v14, 4  ;;  %v3479_v21 = vld [vmem:[#allocation47_spill] sm:$0xff]  ;;  %v3481_v59 = vld [vmem:[#allocation48_spill] sm:$0xff] }
 0x18a   :  { %v1332_v12 = vrot.slane %v1331_v6, 2  ;;  %v1368_v62 = vsel %vm1367_vm2, %v3474_v50, %v1366_v10  ;;  %v1378_v55 = vsel %vm1365_vm1, %v3479_v21, %v1377_v38  ;;  %v3486_v10 = vld [vmem:[#allocation50_spill] sm:$0xff]  ;;  %v3489_v54 = vld [vmem:[#allocation15_spill] sm:$0xff] }
 0x18b   :  { %v1326_v58 = vadd.f32 %v1325_v13, %v1324_v23  ;;  %v1342_v8 = vadd.f32 %v1341_v36, %v1340_v14  ;;  %v1370_v0 = vsel %vm1369_vm3, %v3475_v7, %v1368_v62  ;;  %v1379_v56 = vsel %vm1367_vm2, %v3481_v59, %v1378_v55  ;;  %v3482_v23 = vld [vmem:[#allocation17_spill] sm:$0xff]  ;;  %v3483_v14 = vld [vmem:[#allocation18_spill] sm:$0xff]  ;;  %v3487_v62 = vld [vmem:[#allocation19_spill] sm:$0xff] }
 0x18c   :  { %v1333_v63 = vadd.f32 %v1332_v12, %v1331_v6  ;;  %v1372_v39 = vsel %vm1371_vm4, %v3478_v47, %v1370_v0  ;;  %v1401_v6 = vsel %vm1363_vm0, %v3483_v14, %v3482_v23  ;;  %v3485_v36 = vld [vmem:[#allocation49_spill] sm:$0xff]  ;;  %v3490_v48 = vld [vmem:[#allocation51_spill] sm:$0xff]  ;;  %v3494_v55 = vld [vmem:[#allocation20_spill] sm:$0xff] }
 0x18d   :  { %v1327_v2 = vrot.slane %v1326_v58, 1  ;;  %v1343_v3 = vrot.slane %v1342_v8, 2  ;;  %v1374_v44 = vsel %vm1373_vm5, %v3480_v57, %v1372_v39  ;;  %v1380_v12 = vsel %vm1369_vm3, %v3485_v36, %v1379_v56  ;;  %v3488_v0 = vld [vmem:[#allocation13_spill] sm:$0xff]  ;;  %v3493_v39 = vld [vmem:[#allocation52_spill] sm:$0xff]  ;;  %v3496_v59 = vld [vmem:[#allocation23_spill] sm:$0xff] }
 0x18e   :  { %v1334_v24 = vrot.slane %v1333_v63, 1  ;;  %v1376_v13 = vsel %vm1375_vm6, %v3484_v49, %v1374_v44  ;;  %v1381_v50 = vsel %vm1371_vm4, %v3486_v10, %v1380_v12  ;;  %v1402_v7 = vsel %vm1365_vm1, %v3487_v62, %v1401_v6  ;;  %v3495_v57 = vld [vmem:[#allocation56_spill] sm:$0xff]  ;;  %v3497_v56 = vld [vmem:[#allocation25_spill] sm:$0xff]  ;;  %v3500_v12 = vld [vmem:[#allocation26_spill] sm:$0xff] }
 0x18f   :  { %v2960_v17 = vadd.f32 %v1327_v2, %v1326_v58  ;;  %v1344_v51 = vadd.f32 %v1343_v3, %v1342_v8  ;;  %v1408_v58 = vsel %vm1363_vm0, %v3489_v54, %v3488_v0  ;;  %1645 = vst [vmem:[#allocation7] sm:$0xff] %v1376_v13  ;;  %v1382_v38 = vsel %vm1373_vm5, %v3490_v48, %v1381_v50  ;;  %v3491_v2 = vld [vmem:[#allocation24_spill] sm:$0xff]  ;;  %v3498_v6 = vld [vmem:[#allocation21_spill] sm:$0xff] }
 0x190   :  { %v2966_v43 = vadd.f32 %v1334_v24, %v1333_v63  ;;  %v1403_v3 = vsel %vm1367_vm2, %v3491_v2, %v1402_v7  ;;  %v3492_v63 = vld [vmem:[#allocation55_spill] sm:$0xff]  ;;  %v1383_v21 = vsel %vm1375_vm6, %v3493_v39, %v1382_v38  ;;  %v1430_v23 = vsel %vm1363_vm0, %v3497_v56, %v3496_v59  ;;  %v3499_v13 = vld [vmem:[#allocation57_spill] sm:$0xff]  ;;  %v3502_v7 = vld [vmem:[#allocation58_spill] sm:$0xff] }
 0x191   :  { %v1345_v8 = vrot.slane %v1344_v51, 1  ;;  %v1409_v47 = vsel %vm1365_vm1, %v3492_v63, %v1408_v58  ;;  %v1404_v24 = vsel %vm1369_vm3, %v3494_v55, %v1403_v3  ;;  %v1431_v10 = vsel %vm1365_vm1, %v3500_v12, %v1430_v23  ;;  %1646 = vst [vmem:[#allocation7 + $0x8] sm:$0xff] %v1383_v21  ;;  %v3501_v50 = vld [vmem:[#allocation53_spill] sm:$0xff]  ;;  %v3503_v54 = vld [vmem:[#allocation60_spill] sm:$0xff]  ;;  %v3506_v38 = vld [vmem:[#allocation54_spill] sm:$0xff] }
 0x192   :  { %v1410_v44 = vsel %vm1367_vm2, %v3495_v57, %v1409_v47  ;;  %v1405_v49 = vsel %vm1371_vm4, %v3498_v6, %v1404_v24  ;;  %v3504_v58 = vld [vmem:[#allocation16_spill] sm:$0xff]  ;;  %v3507_v3 = vld [vmem:[#allocation59_spill] sm:$0xff]  ;;  %v3508_v47 = vld [vmem:[#allocation61_spill] sm:$0xff] }
 0x193   :  { %v2990_v14 = vadd.f32 %v1345_v8, %v1344_v51  ;;  %v1411_v36 = vsel %vm1369_vm3, %v3499_v13, %v1410_v44  ;;  %v1406_v62 = vsel %vm1373_vm5, %v3501_v50, %v1405_v49  ;;  %v1432_v51 = vsel %vm1367_vm2, %v3503_v54, %v1431_v10  ;;  %v3505_v8 = vld [vmem:[#allocation64_spill] sm:$0xff]  ;;  %v3509_v21 = vld [vmem:[#allocation65_spill] sm:$0xff]  ;;  %v3510_v24 = vld [vmem:[#allocation62_spill] sm:$0xff] }
 0x194   :  { %v1412_v0 = vsel %vm1371_vm4, %v3502_v7, %v1411_v36  ;;  %v1437_v48 = vsel %vm1363_vm0, %v3505_v8, %v3504_v58  ;;  %v1407_v2 = vsel %vm1375_vm6, %v3506_v38, %v1406_v62  ;;  %v1433_v39 = vsel %vm1369_vm3, %v3508_v47, %v1432_v51  ;;  %v3511_v44 = vld [vmem:[#allocation66_spill] sm:$0xff]  ;;  %v3512_v56 = vld [vmem:[#allocation27_spill] sm:$0xff]  ;;  %v3513_v23 = vld [vmem:[#allocation28_spill] sm:$0xff] }
 0x195   :  { %v3011_v63 = vsel %vm1373_vm5, %v3507_v3, %v1412_v0  ;;  %v1438_v55 = vsel %vm1365_vm1, %v3509_v21, %v1437_v48  ;;  %v1434_v57 = vsel %vm1371_vm4, %v3510_v24, %v1433_v39  ;;  %v1457_v6 = vsel %vm1373_vm5, %v3513_v23, %v3512_v56  ;;  %v3514_v49 = vld [vmem:[#allocation30_spill] sm:$0xff]  ;;  %v3515_v13 = vld [vmem:[#allocation31_spill] sm:$0xff]  ;;  %1647 = vst [vmem:[#allocation7 + $0x10] sm:$0xff] %v1407_v2  ;;  %v3518_v7 = vld [vmem:[#allocation29_spill] sm:$0xff] }
 0x196   :  { %v1439_v59 = vsel %vm1367_vm2, %v3511_v44, %v1438_v55  ;;  %v1459_v36 = vsel %vm1363_vm0, %v3515_v13, %v3514_v49  ;;  %v3516_v12 = vld [vmem:[#allocation63_spill] sm:$0xff]  ;;  %v3035_v0 = vsel %vm1375_vm6, %v3518_v7, %v1457_v6  ;;  %v3519_v54 = vld [vmem:[#allocation32_spill] sm:$0xff]  ;;  %v3520_v58 = vld [vmem:[#allocation14_spill] sm:$0xff] }
 0x197   :  { %v1435_v10 = vsel %vm1373_vm5, %v3516_v12, %v1434_v57  ;;  %v3517_v50 = vld [vmem:[#allocation67_spill] sm:$0xff]  ;;  %v1460_v51 = vsel %vm1365_vm1, %v3519_v54, %v1459_v36  ;;  %v3521_v48 = vld [vmem:[#allocation33_spill] sm:$0xff]  ;;  %v3523_v3 = vld [vmem:[#allocation70_spill] sm:$0xff] }
 0x198   :  { %v3031_v62 = vsel %vm1369_vm3, %v3517_v50, %v1439_v59  ;;  %v1436_v8 = vsel %vm1375_vm6, %v3520_v58, %v1435_v10  ;;  %v1461_v38 = vsel %vm1367_vm2, %v3521_v48, %v1460_v51  ;;  %v3522_v2 = vld [vmem:[#allocation69_spill] sm:$0xff]  ;;  %v3524_v39 = vld [vmem:[#allocation74_spill] sm:$0xff]  ;;  %v3525_v21 = vld [vmem:[#allocation75_spill] sm:$0xff] }
 0x199   :  { %v3046_v47 = vsel %vm1363_vm0, %v3523_v3, %v3522_v2  ;;  %v1482_v55 = vsel %vm1367_vm2, %v3525_v21, %v3524_v39  ;;  %v3526_v24 = vld [vmem:[#allocation34_spill] sm:$0xff]  ;;  %v3527_v44 = vld [vmem:[#allocation76_spill] sm:$0xff]  ;;  %v3529_v23 = vld [vmem:[#allocation81_spill] sm:$0xff]  ;;  %1649 = vst [vmem:[#allocation7 + $0x20] sm:$0xff] %v1436_v8 }
 0x19a   :  { %v1462_v57 = vsel %vm1369_vm3, %v3526_v24, %v1461_v38  ;;  %v1483_v59 = vsel %vm1369_vm3, %v3527_v44, %v1482_v55  ;;  %v3528_v56 = vld [vmem:[#allocation80_spill] sm:$0xff]  ;;  %v3530_v49 = vld [vmem:[#allocation86_spill] sm:$0xff]  ;;  %v3531_v13 = vld [vmem:[#allocation87_spill] sm:$0xff] }
 0x19b   :  { %v1487_v6 = vsel %vm1363_vm0, %v3529_v23, %v3528_v56  ;;  %v3061_v36 = vsel %vm1375_vm6, %v3531_v13, %v3530_v49  ;;  %v3532_v12 = vld [vmem:[#allocation35_spill] sm:$0xff]  ;;  %v3533_v50 = vld [vmem:[#allocation77_spill] sm:$0xff]  ;;  %v3534_v54 = vld [vmem:[#allocation82_spill] sm:$0xff] }
 0x19c   :  { %v1463_v10 = vsel %vm1371_vm4, %v3532_v12, %v1462_v57  ;;  %v1484_v7 = vsel %vm1371_vm4, %v3533_v50, %v1483_v59  ;;  %v1488_v51 = vsel %vm1365_vm1, %v3534_v54, %v1487_v6  ;;  %v3535_v58 = vld [vmem:[#allocation88_spill] sm:$0xff]  ;;  %v3536_v48 = vld [vmem:[#allocation89_spill] sm:$0xff]  ;;  %v3538_v39 = vld [vmem:[#allocation78_spill] sm:$0xff] }
 0x19d   :  { %v1506_v38 = vsel %vm1363_vm0, %v3536_v48, %v3535_v58  ;;  %v3537_v2 = vld [vmem:[#allocation36_spill] sm:$0xff]  ;;  %v1485_v21 = vsel %vm1373_vm5, %v3538_v39, %v1484_v7  ;;  %v3539_v8 = vld [vmem:[#allocation83_spill] sm:$0xff]  ;;  %v3540_v24 = vld [vmem:[#allocation90_spill] sm:$0xff]  ;;  %v1532_v58 = vsel %vm1363_vm0, %v2712_v61, %v2680_v4  ;;  %v1545_v39 = vsel %vm1369_vm3, %v2718_v27, %v2716_v15 }
 0x19e   :  { %v1464_v3 = vsel %vm1373_vm5, %v3537_v2, %v1463_v10  ;;  %v1489_v55 = vsel %vm1367_vm2, %v3539_v8, %v1488_v51  ;;  %v1507_v57 = vsel %vm1365_vm1, %v3540_v24, %v1506_v38  ;;  %v3541_v44 = vld [vmem:[#allocation68_spill] sm:$0xff]  ;;  %v3542_v56 = vld [vmem:[#allocation79_spill] sm:$0xff]  ;;  %v3545_v10 = vld [vmem:[#allocation85_spill] sm:$0xff]  ;;  %v1526_v51 = vsel %vm1365_vm1, %v2661_v20, %v2659_v5 }
 0x19f   :  { %v1465_v59 = vsel %vm1375_vm6, %v3541_v44, %v1464_v3  ;;  %v1486_v23 = vsel %vm1375_vm6, %v3542_v56, %v1485_v21  ;;  %v3543_v6 = vld [vmem:[#allocation84_spill] sm:$0xff]  ;;  %v3544_v13 = vld [vmem:[#allocation91_spill] sm:$0xff]  ;;  %v3547_v48 = vld [vmem:[#allocation93_spill] sm:$0xff]  ;;  %v1527_v2 = vsel %vm1367_vm2, %v2663_v32, %v1526_v51  ;;  %v1533_v3 = vsel %vm1365_vm1, %v2714_v37, %v1532_v58 }
 0x1a0   :  { %v1490_v49 = vsel %vm1369_vm3, %v3543_v6, %v1489_v55  ;;  %v1508_v12 = vsel %vm1367_vm2, %v3544_v13, %v1507_v57  ;;  %v3546_v7 = vld [vmem:[#allocation92_spill] sm:$0xff]  ;;  %1651 = vst [vmem:[#allocation7 + $0x30] sm:$0xff] %v1465_v59  ;;  %v3550_v8 = vld [vmem:[#allocation99_spill] sm:$0xff]  ;;  %v3553_v57 = vld [vmem:[#allocation73_spill] sm:$0xff]  ;;  %v1565_v58 = vsel %vm1363_vm0, %v2776_v40, %v2774_v26 }
 0x1a1   :  { %v1491_v50 = vsel %vm1371_vm4, %v3545_v10, %v1490_v49  ;;  %v1509_v54 = vsel %vm1369_vm3, %v3546_v7, %v1508_v12  ;;  %v3548_v20 = vld [vmem:[#allocation72_spill] sm:$0xff]  ;;  %v3552_v24 = vld [vmem:[#allocation11_spill] sm:$0xff]  ;;  %v3554_v15 = vld [vmem:[#allocation97_spill] sm:$0xff]  ;;  %v1562_v10 = vsel %vm1371_vm4, %v2768_v30, %v2766_v1  ;;  %v1566_v1 = vsel %vm1365_vm1, %v2778_v16, %v1565_v58 }
 0x1a2   :  { %v1510_v38 = vsel %vm1371_vm4, %v3547_v48, %v1509_v54  ;;  %v1528_v61 = vsel %vm1369_vm3, %v3548_v20, %v1527_v2  ;;  %v3549_v4 = vld [vmem:[#allocation96_spill] sm:$0xff]  ;;  %v3556_v56 = vld [vmem:[#allocation94_spill] sm:$0xff]  ;;  %v3558_v7 = vld [vmem:[#allocation95_spill] sm:$0xff]  ;;  %v1563_v51 = vsel %vm1373_vm5, %v2770_v25, %v1562_v10  ;;  %v1577_v48 = vsel %vm1371_vm4, %v2822_v18, %v2818_v11 }
 0x1a3   :  { %v1511_v5 = vsel %vm1373_vm5, %v2653_v33, %v1510_v38  ;;  %v1546_v21 = vsel %vm1371_vm4, %v3549_v4, %v1545_v39  ;;  %v3551_v55 = vld [vmem:[#allocation12_spill] sm:$0xff]  ;;  %v1529_v44 = vsel %vm1371_vm4, %v3553_v57, %v1528_v61  ;;  %v3557_v49 = vld [vmem:[#allocation98_spill] sm:$0xff]  ;;  %v3561_v39 = vld [vmem:[#allocation105_spill] sm:$0xff] }
 0x1a4   :  { %v1549_v32 = vsel %vm1363_vm0, %v3551_v55, %v3550_v8  ;;  %v1512_v37 = vsel %vm1375_vm6, %v3552_v24, %v1511_v5  ;;  %v1547_v27 = vsel %vm1373_vm5, %v3554_v15, %v1546_v21  ;;  %v3555_v33 = vld [vmem:[#allocation100_spill] sm:$0xff]  ;;  %v1530_v6 = vsel %vm1373_vm5, %v3556_v56, %v1529_v44  ;;  %v3559_v30 = vld [vmem:[#allocation102_spill] sm:$0xff]  ;;  %v3562_v5 = vld [vmem:[#allocation101_spill] sm:$0xff] }
 0x1a5   :  { %v1550_v59 = vsel %vm1365_vm1, %v3555_v33, %v1549_v32  ;;  %v1548_v13 = vsel %vm1375_vm6, %v3557_v49, %v1547_v27  ;;  %1654 = vst [vmem:[#allocation7 + $0x48] sm:$0xff] %v1512_v37  ;;  %v1531_v54 = vsel %vm1375_vm6, %v3558_v7, %v1530_v6  ;;  %v1578_v38 = vsel %vm1373_vm5, %v3559_v30, %v1577_v48  ;;  %v3560_v2 = vld [vmem:[#allocation104_spill] sm:$0xff]  ;;  %v3563_v40 = vld [vmem:[#allocation103_spill] sm:$0xff]  ;;  %v3564_v11 = vld [vmem:[#allocation106_spill] sm:$0xff] }
 0x1a6   :  { %v1551_v12 = vsel %vm1367_vm2, %v2764_v42, %v1550_v59  ;;  %v1564_v42 = vsel %vm1375_vm6, %v2772_v53, %v1563_v51  ;;  %v1580_v25 = vsel %vm1363_vm0, %v3561_v39, %v3560_v2  ;;  %v1567_v26 = vsel %vm1367_vm2, %v3562_v5, %v1566_v1  ;;  %v3565_v53 = vld [vmem:[#allocation107_spill] sm:$0xff]  ;;  %v3566_v61 = vld [vmem:[#allocation108_spill] sm:$0xff]  ;;  %v3567_v32 = vld [vmem:[#allocation109_spill] sm:$0xff] }
 0x1a7   :  { %v1579_v20 = vsel %vm1375_vm6, %v3563_v40, %v1578_v38  ;;  %v1581_v18 = vsel %vm1365_vm1, %v3564_v11, %v1580_v25  ;;  %v1590_v16 = vsel %vm1369_vm3, %v3565_v53, %v2867_v28  ;;  %v1601_v21 = vsel %vm1365_vm1, %v2893_v9, %v2891_v22  ;;  %v3568_v9 = vld [vmem:[#allocation110_spill] sm:$0xff] }
 0x1a8   :  { %v1591_v4 = vsel %vm1371_vm4, %v3566_v61, %v1590_v16  ;;  %v1610_v8 = vsel %vm1375_vm6, %v2916_v41, %v2913_v35  ;;  %v1611_v55 = vsel %vm1363_vm0, %v2927_v45, %v2918_v19  ;;  %v1602_v28 = vsel %vm1367_vm2, %v2895_v31, %v1601_v21  ;;  %v3569_v45 = vld [vmem:[#allocation22_spill] sm:$0xff] }
 0x1a9   :  { %v1592_v24 = vsel %vm1373_vm5, %v3567_v32, %v1591_v4  ;;  %v1617_v37 = vsel %vm1367_vm2, %v2936_v52, %v2931_v34  ;;  %v1622_v22 = vsel %vm1373_vm5, %v2966_v43, %v2960_v17  ;;  %v1603_v41 = vsel %vm1369_vm3, %v2897_v29, %v1602_v28 }
 0x1aa   :  { %v1593_v35 = vsel %vm1375_vm6, %v3568_v9, %v1592_v24  ;;  %v1618_v19 = vsel %vm1369_vm3, %v2938_v60, %v1617_v37  ;;  %v1604_v31 = vsel %vm1371_vm4, %v2899_v46, %v1603_v41  ;;  %v1625_v34 = vsel %vm1624_vm7, %v3011_v63, %v3569_v45  ;;  %v3570_v46 = vld [vmem:[#allocation71_spill] sm:$0xff] }
 0x1ab   :  { %v1627_v52 = vsel %vm1626_vm8, %v3031_v62, %v3035_v0  ;;  %v1629_v29 = vsel %vm1628_vm9, %v3046_v47, %v1486_v23  ;;  %1648 = vst [vmem:[#allocation7 + $0x18] sm:$0xff] %v1625_v34  ;;  %v1631_v60 = vsel %vm1630_vm10, %v1491_v50, %v3061_v36  ;;  %v1633_v17 = vsel %vm1632_vm11, %v3570_v46, %v1531_v54  ;;  %v3571_v47 = vld [vmem:[#allocation111_spill] sm:$0xff] }
 0x1ac   :  { %1650 = vst [vmem:[#allocation7 + $0x28] sm:$0xff] %v1627_v52  ;;  %1652 = vst [vmem:[#allocation7 + $0x38] sm:$0xff] %v1629_v29  ;;  %v1635_v43 = vsel %vm1634_vm12, %v1533_v3, %v1548_v13  ;;  %v1637_v63 = vsel %vm1636_vm13, %v1551_v12, %v1564_v42  ;;  %v1638_v62 = vsel %vm1636_vm13, %v1567_v26, %v1579_v20 }
 0x1ad   :  { %v1639_v0 = vsel %vm1634_vm12, %v1581_v18, %v1593_v35  ;;  %1653 = vst [vmem:[#allocation7 + $0x40] sm:$0xff] %v1631_v60  ;;  %1655 = vst [vmem:[#allocation7 + $0x50] sm:$0xff] %v1633_v17  ;;  %v1640_v23 = vsel %vm1632_vm11, %v3571_v47, %v1604_v31  ;;  %v1642_v36 = vsel %vm1628_vm9, %v1611_v55, %v1618_v19 }
 0x1ae   :  { %1656 = vst [vmem:[#allocation7 + $0x58] sm:$0xff] %v1635_v43  ;;  %1657 = vst [vmem:[#allocation7 + $0x60] sm:$0xff] %v1637_v63  ;;  %v1641_v50 = vsel %vm1630_vm10, %v1640_v23, %v1610_v8  ;;  %v1643_v57 = vsel %vm1626_vm8, %v1642_v36, %v1622_v22 }
 0x1af   :  { %1658 = vst [vmem:[#allocation7 + $0x68] sm:$0xff] %v1638_v62  ;;  %1659 = vst [vmem:[#allocation7 + $0x70] sm:$0xff] %v1639_v0  ;;  %v1644_v3 = vsel %vm1624_vm7, %v1643_v57, %v2990_v14 }
 0x1b0   :  { %1660 = vst [vmem:[#allocation7 + $0x78] sm:$0xff] %v1641_v50  ;;  %1661 = vst [vmem:[#allocation7 + $0x80] sm:$0xff] %v1644_v3 }
 0x1b1   :  { %1778 = shalt.err (!%p1775_p6)
}
 0x1b2   :  { %s1779_s10 = scalar_lea.hbm %s3226_s2, 2176 }
 0x1b3   :  { %p1780_p7 = scmp.ne.s32.totalorder %s3226_s2, %s1779_s10  ;;  %p1783_p8 = scmp.lt.u32.totalorder %s1779_s10, %s3226_s2 }
 0x1b5   :  { %p1785_p9 = pnand %p1783_p8, %p1780_p7 }
 0x1b7   :  { %1788 = shalt.err (!%p1785_p9)
}
 0x1b8   :  { %1673 = dma.vmem_to_hbm [thread:$0]  %s1668_s6, 2176, %s3226_s2, [#allocation4], %s1796_s19, %s1796_s19, %s1797_s20  }
 0x1b9   :  { %1793 = dma.done.wait [#allocation4], 2176  }
 0x1ba   :  { %1794 = vsyncadd [#allocation4], 4294965120 }
 0x1bb   :  { %1677 = vsyncpa [#allocation3], 1 }
 0x1bc   :  { %1678 = vsyncpa [#allocation6], 1 }
 0x1bd   :  { %1679 = vsyncpa [#allocation4], 1 }

</bundles_post_ra>
